<compile_context>
chip_gen: v6e
topology: v6e:2x2x1
jax: 0.10.0
libtpu: 0.0.40
codegen_flags: <defaults>
</compile_context>

<pallas_src>
import functools

import jax
import jax.numpy as jnp
from jax.experimental import pallas as pl
from jax.experimental.pallas import tpu as pltpu

# ----------------------------- "Config" -----------------------------
NUM_CNN_LAYERS = 2
SKIP_LAYER = True
BATCH_NORM = True
DROP_OUT = 0.1          # eval-mode dropout == identity
BN_EPS = 1e-5
LANE = 128              # lane-dense padding unit


# ----------------------------- fused kernel -----------------------------
def rgae_encoder_kernel(a_ref, x_ref, w1_ref, b1_ref, w2_ref, b2_ref, ws_ref, bs_ref,
                        o_ref, g_ref, *, num_relations, n_pad, c_pad):
    """Fused forward: conv1(+folded BN)+ELU -> conv2+ELU -> (+ skip Linear) -> ELU.

    a_ref : (n_pad, R*n_pad) bf16   flat [N, R, N] adjacency (built & normalized in wrapper)
    x_ref : (n_pad, c_pad)   bf16
    w*_ref: (c_pad, (R+1)*c_pad) bf16   column-concat [W_root | W_1 | ... | W_R]
    b*_ref: (1, c_pad) f32
    g_ref : (R*n_pad, c_pad) bf16 scratch holding the stacked H@W_r blocks.
    """
    R = num_relations

    def elu(v):
        # exp on min(v, 0) avoids overflow in the unselected branch; dropout (eval) = identity
        return jnp.where(v > 0.0, v, jnp.exp(jnp.minimum(v, 0.0)) - 1.0)

    def rgcn(h_bf16, w_ref, b_ref):
        # ONE wide MXU matmul for all narrow products: H @ [W_root | W_1 | ... | W_R].
        hw = jnp.dot(h_bf16, w_ref[...], preferred_element_type=jnp.float32)
        root = hw[:, :c_pad]
        # Stack the per-relation H@W_r blocks into the (R*N, C) aggregation operand.
        for r in range(R):                                   # R is small, unrolled
            g_ref[pl.ds(r * n_pad, n_pad), :] = (
                hw[:, (r + 1) * c_pad:(r + 2) * c_pad].astype(jnp.bfloat16))
        # ONE long-accumulation matmul: A_flat (N, R*N) @ G (R*N, C).  The cross-relation sum
        # happens inside MXU accumulation instead of R VALU tile-adds.
        agg = jnp.dot(a_ref[...], g_ref[...], preferred_element_type=jnp.float32)
        return root + agg + b_ref[...]

    x = x_ref[...]                                            # bf16
    h1 = elu(rgcn(x, w1_ref, b1_ref))                         # layer 0 (+ folded BN) + ELU, f32
    h2 = elu(rgcn(h1.astype(jnp.bfloat16), w2_ref, b2_ref))   # layer 1 + ELU (no BN on last)
    skip = jnp.dot(x, ws_ref[...], preferred_element_type=jnp.float32) + bs_ref[...]
    o_ref[...] = elu(h2 + skip)                               # skip add + final ELU


# ----------------------------- helpers / glue -----------------------------
def _round_up(v, m):
    return (v + m - 1) // m * m


def _pad_to(arr, shape):
    return jnp.pad(arr, [(0, t - s) for s, t in zip(arr.shape, shape)])


def _full_spec(shape):
    # Block == full array, so the (8,128) divisibility constraint is waived.
    nd = len(shape)
    return pl.BlockSpec(shape, lambda i, _nd=nd: (0,) * _nd)


def build_rel_adj(edge_index, edge_types, num_nodes, num_relations):
    """Per-relation mean-normalized dense adjacency, matching FastRGCNConv(aggr='mean').

    A[r, i, j] = (#edges j->i of type r) / max(#type-r edges into i, 1).
    Built with an O(E) scatter-add (the previous one-hot einsum was O(E*R*N^2)).
    """
    src = edge_index[0]
    dst = edge_index[1]
    a = jnp.zeros((num_relations, num_nodes, num_nodes), jnp.float32)
    a = a.at[edge_types, dst, src].add(1.0)
    deg = a.sum(axis=2, keepdims=True)                       # per-(node, relation) in-degree
    return a / jnp.maximum(deg, 1.0)


def init_params(key, in_channels, out_channels, num_relations, num_layers):
    """Deterministic xavier_normal-style init; biases zero (matches _init_weights)."""
    params = {"conv_w": [], "conv_root": [], "conv_b": [],
              "bn_mean": [], "bn_var": [], "bn_gamma": [], "bn_beta": []}
    cin = in_channels
    for _ in range(num_layers):
        key, kw, kr = jax.random.split(key, 3)
        std = jnp.sqrt(2.0 / (cin + out_channels))
        params["conv_w"].append(
            std * jax.random.normal(kw, (num_relations, cin, out_channels), jnp.float32))
        params["conv_root"].append(
            std * jax.random.normal(kr, (cin, out_channels), jnp.float32))
        params["conv_b"].append(jnp.zeros((out_channels,), jnp.float32))
        params["bn_mean"].append(jnp.zeros((out_channels,), jnp.float32))
        params["bn_var"].append(jnp.ones((out_channels,), jnp.float32))
        params["bn_gamma"].append(jnp.ones((out_channels,), jnp.float32))
        params["bn_beta"].append(jnp.zeros((out_channels,), jnp.float32))
        cin = out_channels
    if SKIP_LAYER:
        key, ks = jax.random.split(key)
        std = jnp.sqrt(2.0 / (in_channels + out_channels))
        params["skip_w"] = std * jax.random.normal(ks, (in_channels, out_channels), jnp.float32)
        params["skip_b"] = jnp.zeros((out_channels,), jnp.float32)
    return params


def _layer_weights(params, i, fold_bn, r, c_pad):
    """Column-concat [W_root | W_1 .. W_R], optionally fold eval-mode BN, pad, cast to bf16."""
    w_rel = params["conv_w"][i]                      # (R, Cin, Cout)
    w_root = params["conv_root"][i]                  # (Cin, Cout)
    b = params["conv_b"][i]
    if fold_bn:
        s = params["bn_gamma"][i] * jax.lax.rsqrt(params["bn_var"][i] + BN_EPS)
        w_rel = w_rel * s[None, None, :]
        w_root = w_root * s[None, :]
        b = (b - params["bn_mean"][i]) * s + params["bn_beta"][i]
    stacked = jnp.concatenate([w_root[None], w_rel], axis=0)          # (R+1, Cin, Cout), root 1st
    stacked = _pad_to(stacked.astype(jnp.float32), (r + 1, c_pad, c_pad))
    w_wide = stacked.transpose(1, 0, 2).reshape(c_pad, (r + 1) * c_pad)  # [W_root|W_1|..|W_R]
    b_pad = _pad_to(b.reshape(1, -1).astype(jnp.float32), (1, c_pad))
    return w_wide.astype(jnp.bfloat16), b_pad


def rgae_encoder_forward(params, x, edge_index, edge_types, num_relations):
    assert len(params["conv_w"]) == 2 and SKIP_LAYER, \
        "fused kernel is specialized for Config: 2 conv layers + skip connection"
    n, in_c = x.shape
    out_c = params["conv_b"][0].shape[0]
    r = num_relations
    n_pad = max(_round_up(n, LANE), LANE)                    # lane-dense contraction dim for A
    c_pad = max(LANE, _round_up(max(in_c, out_c), LANE))

    # A in flat [N, R, N] layout: pad each relation block, then transpose+reshape, cast bf16.
    a = _pad_to(build_rel_adj(edge_index, edge_types, n, r), (r, n_pad, n_pad))
    a_flat = a.transpose(1, 0, 2).reshape(n_pad, r * n_pad).astype(jnp.bfloat16)
    x_pad = _pad_to(x.astype(jnp.float32), (n_pad, c_pad)).astype(jnp.bfloat16)

    # BN only applies for i < num_layers - 1  ->  fold into layer 0; layer 1 stays raw.
    w1p, b1p = _layer_weights(params, 0, BATCH_NORM, r, c_pad)
    w2p, b2p = _layer_weights(params, 1, False, r, c_pad)
    wsp = _pad_to(params["skip_w"].astype(jnp.float32), (c_pad, c_pad)).astype(jnp.bfloat16)
    bsp = _pad_to(params["skip_b"].reshape(1, -1).astype(jnp.float32), (1, c_pad))

    # Explicit scoped-VMEM budget sized to the resident set (x2 buffering + headroom).
    resident_bytes = (n_pad * r * n_pad * 2          # A_flat (bf16)
                      + n_pad * c_pad * 2            # x (bf16)
                      + 2 * c_pad * (r + 1) * c_pad * 2  # w1, w2 wide (bf16)
                      + c_pad * c_pad * 2            # skip W (bf16)
                      + 3 * c_pad * 4                # biases (f32)
                      + n_pad * c_pad * 4            # output (f32)
                      + r * n_pad * c_pad * 2)       # G scratch (bf16)
    vmem_limit = int(min(max(2 * resident_bytes + (4 << 20), 32 << 20), 100 << 20))

    kern = functools.partial(rgae_encoder_kernel,
                             num_relations=r, n_pad=n_pad, c_pad=c_pad)
    out_pad = pl.pallas_call(
        kern,
        out_shape=jax.ShapeDtypeStruct((n_pad, c_pad), jnp.float32),
        grid=(1,),
        in_specs=[
            _full_spec((n_pad, r * n_pad)),
            _full_spec((n_pad, c_pad)),
            _full_spec((c_pad, (r + 1) * c_pad)),
            _full_spec((1, c_pad)),
            _full_spec((c_pad, (r + 1) * c_pad)),
            _full_spec((1, c_pad)),
            _full_spec((c_pad, c_pad)),
            _full_spec((1, c_pad)),
        ],
        out_specs=_full_spec((n_pad, c_pad)),
        scratch_shapes=[pltpu.VMEM((r * n_pad, c_pad), jnp.bfloat16)],
        compiler_params=pltpu.CompilerParams(
            dimension_semantics=("arbitrary",),
            vmem_limit_bytes=vmem_limit),
    )(a_flat, x_pad, w1p, b1p, w2p, b2p, wsp, bsp)

    return out_pad[:n, :out_c]


# ----------------------------- pure-JAX f32 reference -----------------------------
def reference_forward(params, x, edge_index, edge_types, num_relations):
    def elu(v):
        return jnp.where(v > 0.0, v, jnp.exp(jnp.minimum(v, 0.0)) - 1.0)

    a = build_rel_adj(edge_index, edge_types, x.shape[0], num_relations)
    h = x
    n_layers = len(params["conv_w"])
    for i in range(n_layers):
        out = h @ params["conv_root"][i] + params["conv_b"][i]
        for rr in range(num_relations):
            out = out + a[rr] @ (h @ params["conv_w"][i][rr])
        if BATCH_NORM and i < n_layers - 1:
            out = ((out - params["bn_mean"][i]) * jax.lax.rsqrt(params["bn_var"][i] + BN_EPS)
                   * params["bn_gamma"][i] + params["bn_beta"][i])
        h = elu(out)                                          # dropout (eval) = identity
    if SKIP_LAYER:
        h = elu(h + x @ params["skip_w"] + params["skip_b"])
    return h


# ----------------------------- main -----------------------------
if __name__ == "__main__":
    N_NODES = 16
    IN_CHANNELS = 8
    OUT_CHANNELS = 32
    NUM_RELATIONS = 3
    N_EDGES = 40

    key = jax.random.PRNGKey(0)
    kx, ksrc, kdst, ktyp, kp = jax.random.split(key, 5)

    x = jax.random.normal(kx, (N_NODES, IN_CHANNELS), jnp.float32)
    src = jax.random.randint(ksrc, (N_EDGES,), 0, N_NODES, jnp.int32)
    dst = jax.random.randint(kdst, (N_EDGES,), 0, N_NODES, jnp.int32)
    edge_index = jnp.stack([src, dst], axis=0)
    edge_types = jax.random.randint(ktyp, (N_EDGES,), 0, NUM_RELATIONS, jnp.int32)

    params = init_params(kp, IN_CHANNELS, OUT_CHANNELS, NUM_RELATIONS, NUM_CNN_LAYERS)

    out = rgae_encoder_forward(params, x, edge_index, edge_types, NUM_RELATIONS)
    out = jax.block_until_ready(out)
    assert out.shape == (N_NODES, OUT_CHANNELS)
    assert bool(jnp.all(jnp.isfinite(out)))

    # bf16-input kernel vs f32 reference (explicit tolerance per review).
    ref = reference_forward(params, x, edge_index, edge_types, NUM_RELATIONS)
    max_err = float(jnp.max(jnp.abs(out - ref)))
    assert max_err < 0.05, f"kernel/reference mismatch: max_abs_err={max_err}"

    print("KERNEL_OK")
</pallas_src>

<mosaic_0001>
module attributes {stable_mosaic.version = 11 : i64} {
  func.func @rgae_encoder_kernel(%arg0: i32, %arg1: memref<128x384xbf16, #tpu.memory_space<vmem>>, %arg2: memref<128x128xbf16, #tpu.memory_space<vmem>>, %arg3: memref<128x512xbf16, #tpu.memory_space<vmem>>, %arg4: memref<1x128xf32, #tpu.memory_space<vmem>>, %arg5: memref<128x512xbf16, #tpu.memory_space<vmem>>, %arg6: memref<1x128xf32, #tpu.memory_space<vmem>>, %arg7: memref<128x128xbf16, #tpu.memory_space<vmem>>, %arg8: memref<1x128xf32, #tpu.memory_space<vmem>>, %arg9: memref<128x128xf32, #tpu.memory_space<vmem>>, %arg10: memref<384x128xbf16, #tpu.memory_space<vmem>>) attributes {dimension_semantics = [#tpu.dimension_semantics<arbitrary>], iteration_bounds = array<i64: 1>, scalar_prefetch = 0 : i64, scratch_operands = 1 : i64, tpu.core_type = #tpu.core_type<tc>, window_params = [{pipeline_mode = #tpu.pipeline_mode<synchronous>, transform_indices = @transform_0, window_bounds = array<i64: 128, 384>}, {pipeline_mode = #tpu.pipeline_mode<synchronous>, transform_indices = @transform_1, window_bounds = array<i64: 128, 128>}, {pipeline_mode = #tpu.pipeline_mode<synchronous>, transform_indices = @transform_2, window_bounds = array<i64: 128, 512>}, {pipeline_mode = #tpu.pipeline_mode<synchronous>, transform_indices = @transform_3, window_bounds = array<i64: 1, 128>}, {pipeline_mode = #tpu.pipeline_mode<synchronous>, transform_indices = @transform_4, window_bounds = array<i64: 128, 512>}, {pipeline_mode = #tpu.pipeline_mode<synchronous>, transform_indices = @transform_5, window_bounds = array<i64: 1, 128>}, {pipeline_mode = #tpu.pipeline_mode<synchronous>, transform_indices = @transform_6, window_bounds = array<i64: 128, 128>}, {pipeline_mode = #tpu.pipeline_mode<synchronous>, transform_indices = @transform_7, window_bounds = array<i64: 1, 128>}, {pipeline_mode = #tpu.pipeline_mode<synchronous>, transform_indices = @transform_8, window_bounds = array<i64: 128, 128>}]} {
    %c0 = arith.constant 0 : index
    %c0_0 = arith.constant 0 : index
    %0 = vector.load %arg2[%c0, %c0_0] : memref<128x128xbf16, #tpu.memory_space<vmem>>, vector<128x128xbf16>
    %c0_1 = arith.constant 0 : index
    %c0_2 = arith.constant 0 : index
    %1 = vector.load %arg3[%c0_1, %c0_2] : memref<128x512xbf16, #tpu.memory_space<vmem>>, vector<128x512xbf16>
    %cst = arith.constant dense<0.000000e+00> : vector<128x512xf32>
    %2 = tpu.matmul %0, %1, %cst {dimension_numbers = #tpu.dot_dimension_numbers<[1], [0], [0], [1], [0, 0, 1, 1], [], []>} : vector<128x128xbf16>, vector<128x512xbf16>, vector<128x512xf32> -> vector<128x512xf32>
    %3 = vector.extract_strided_slice %2 {offsets = [0, 0], sizes = [128, 128], strides = [1, 1]} : vector<128x512xf32> to vector<128x128xf32>
    %4 = vector.extract_strided_slice %2 {offsets = [0, 128], sizes = [128, 128], strides = [1, 1]} : vector<128x512xf32> to vector<128x128xf32>
    %5 = arith.truncf %4 : vector<128x128xf32> to vector<128x128xbf16>
    %c0_3 = arith.constant 0 : index
    %c0_4 = arith.constant 0 : index
    %6 = vector.load %arg10[%c0_3, %c0_4] : memref<384x128xbf16, #tpu.memory_space<vmem>>, vector<128x128xbf16>
    tpu.vector_store %arg10[%c0_3, %c0_4], %5 {strides = array<i32>} : memref<384x128xbf16, #tpu.memory_space<vmem>>, vector<128x128xbf16>,
    %7 = vector.extract_strided_slice %2 {offsets = [0, 256], sizes = [128, 128], strides = [1, 1]} : vector<128x512xf32> to vector<128x128xf32>
    %8 = arith.truncf %7 : vector<128x128xf32> to vector<128x128xbf16>
    %c128 = arith.constant 128 : index
    %c0_5 = arith.constant 0 : index
    %9 = vector.load %arg10[%c128, %c0_5] : memref<384x128xbf16, #tpu.memory_space<vmem>>, vector<128x128xbf16>
    tpu.vector_store %arg10[%c128, %c0_5], %8 {strides = array<i32>} : memref<384x128xbf16, #tpu.memory_space<vmem>>, vector<128x128xbf16>,
    %10 = vector.extract_strided_slice %2 {offsets = [0, 384], sizes = [128, 128], strides = [1, 1]} : vector<128x512xf32> to vector<128x128xf32>
    %11 = arith.truncf %10 : vector<128x128xf32> to vector<128x128xbf16>
    %c256 = arith.constant 256 : index
    %c0_6 = arith.constant 0 : index
    %12 = vector.load %arg10[%c256, %c0_6] : memref<384x128xbf16, #tpu.memory_space<vmem>>, vector<128x128xbf16>
    tpu.vector_store %arg10[%c256, %c0_6], %11 {strides = array<i32>} : memref<384x128xbf16, #tpu.memory_space<vmem>>, vector<128x128xbf16>,
    %c0_7 = arith.constant 0 : index
    %c0_8 = arith.constant 0 : index
    %13 = vector.load %arg1[%c0_7, %c0_8] : memref<128x384xbf16, #tpu.memory_space<vmem>>, vector<128x384xbf16>
    %c0_9 = arith.constant 0 : index
    %c0_10 = arith.constant 0 : index
    %14 = vector.load %arg10[%c0_9, %c0_10] : memref<384x128xbf16, #tpu.memory_space<vmem>>, vector<384x128xbf16>
    %cst_11 = arith.constant dense<0.000000e+00> : vector<128x128xf32>
    %15 = tpu.matmul %13, %14, %cst_11 {dimension_numbers = #tpu.dot_dimension_numbers<[1], [0], [0], [1], [0, 0, 1, 1], [], []>} : vector<128x384xbf16>, vector<384x128xbf16>, vector<128x128xf32> -> vector<128x128xf32>
    %16 = arith.addf %3, %15 : vector<128x128xf32>
    %c0_12 = arith.constant 0 : index
    %c0_13 = arith.constant 0 : index
    %17 = vector.load %arg4[%c0_12, %c0_13] : memref<1x128xf32, #tpu.memory_space<vmem>>, vector<1x128xf32>
    %18 = vector.broadcast %17 : vector<1x128xf32> to vector<128x128xf32>
    %19 = arith.addf %16, %18 : vector<128x128xf32>
    %cst_14 = arith.constant 0.000000e+00 : f32
    %20 = vector.broadcast %cst_14 : f32 to vector<128x128xf32>
    %21 = arith.cmpf ogt, %19, %20 : vector<128x128xf32>
    %cst_15 = arith.constant 0.000000e+00 : f32
    %22 = vector.broadcast %cst_15 : f32 to vector<128x128xf32>
    %23 = arith.minimumf %19, %22 : vector<128x128xf32>
    %24 = math.exp %23 : vector<128x128xf32>
    %cst_16 = arith.constant 1.000000e+00 : f32
    %25 = vector.broadcast %cst_16 : f32 to vector<128x128xf32>
    %26 = arith.subf %24, %25 : vector<128x128xf32>
    %27 = arith.select %21, %19, %26 : vector<128x128xi1>, vector<128x128xf32>
    %28 = arith.truncf %27 : vector<128x128xf32> to vector<128x128xbf16>
    %c0_17 = arith.constant 0 : index
    %c0_18 = arith.constant 0 : index
    %29 = vector.load %arg5[%c0_17, %c0_18] : memref<128x512xbf16, #tpu.memory_space<vmem>>, vector<128x512xbf16>
    %cst_19 = arith.constant dense<0.000000e+00> : vector<128x512xf32>
    %30 = tpu.matmul %28, %29, %cst_19 {dimension_numbers = #tpu.dot_dimension_numbers<[1], [0], [0], [1], [0, 0, 1, 1], [], []>} : vector<128x128xbf16>, vector<128x512xbf16>, vector<128x512xf32> -> vector<128x512xf32>
    %31 = vector.extract_strided_slice %30 {offsets = [0, 0], sizes = [128, 128], strides = [1, 1]} : vector<128x512xf32> to vector<128x128xf32>
    %32 = vector.extract_strided_slice %30 {offsets = [0, 128], sizes = [128, 128], strides = [1, 1]} : vector<128x512xf32> to vector<128x128xf32>
    %33 = arith.truncf %32 : vector<128x128xf32> to vector<128x128xbf16>
    %c0_20 = arith.constant 0 : index
    %c0_21 = arith.constant 0 : index
    %34 = vector.load %arg10[%c0_20, %c0_21] : memref<384x128xbf16, #tpu.memory_space<vmem>>, vector<128x128xbf16>
    tpu.vector_store %arg10[%c0_20, %c0_21], %33 {strides = array<i32>} : memref<384x128xbf16, #tpu.memory_space<vmem>>, vector<128x128xbf16>,
    %35 = vector.extract_strided_slice %30 {offsets = [0, 256], sizes = [128, 128], strides = [1, 1]} : vector<128x512xf32> to vector<128x128xf32>
    %36 = arith.truncf %35 : vector<128x128xf32> to vector<128x128xbf16>
    %c128_22 = arith.constant 128 : index
    %c0_23 = arith.constant 0 : index
    %37 = vector.load %arg10[%c128_22, %c0_23] : memref<384x128xbf16, #tpu.memory_space<vmem>>, vector<128x128xbf16>
    tpu.vector_store %arg10[%c128_22, %c0_23], %36 {strides = array<i32>} : memref<384x128xbf16, #tpu.memory_space<vmem>>, vector<128x128xbf16>,
    %38 = vector.extract_strided_slice %30 {offsets = [0, 384], sizes = [128, 128], strides = [1, 1]} : vector<128x512xf32> to vector<128x128xf32>
    %39 = arith.truncf %38 : vector<128x128xf32> to vector<128x128xbf16>
    %c256_24 = arith.constant 256 : index
    %c0_25 = arith.constant 0 : index
    %40 = vector.load %arg10[%c256_24, %c0_25] : memref<384x128xbf16, #tpu.memory_space<vmem>>, vector<128x128xbf16>
    tpu.vector_store %arg10[%c256_24, %c0_25], %39 {strides = array<i32>} : memref<384x128xbf16, #tpu.memory_space<vmem>>, vector<128x128xbf16>,
    %c0_26 = arith.constant 0 : index
    %c0_27 = arith.constant 0 : index
    %41 = vector.load %arg1[%c0_26, %c0_27] : memref<128x384xbf16, #tpu.memory_space<vmem>>, vector<128x384xbf16>
    %c0_28 = arith.constant 0 : index
    %c0_29 = arith.constant 0 : index
    %42 = vector.load %arg10[%c0_28, %c0_29] : memref<384x128xbf16, #tpu.memory_space<vmem>>, vector<384x128xbf16>
    %cst_30 = arith.constant dense<0.000000e+00> : vector<128x128xf32>
    %43 = tpu.matmul %41, %42, %cst_30 {dimension_numbers = #tpu.dot_dimension_numbers<[1], [0], [0], [1], [0, 0, 1, 1], [], []>} : vector<128x384xbf16>, vector<384x128xbf16>, vector<128x128xf32> -> vector<128x128xf32>
    %44 = arith.addf %31, %43 : vector<128x128xf32>
    %c0_31 = arith.constant 0 : index
    %c0_32 = arith.constant 0 : index
    %45 = vector.load %arg6[%c0_31, %c0_32] : memref<1x128xf32, #tpu.memory_space<vmem>>, vector<1x128xf32>
    %46 = vector.broadcast %45 : vector<1x128xf32> to vector<128x128xf32>
    %47 = arith.addf %44, %46 : vector<128x128xf32>
    %cst_33 = arith.constant 0.000000e+00 : f32
    %48 = vector.broadcast %cst_33 : f32 to vector<128x128xf32>
    %49 = arith.cmpf ogt, %47, %48 : vector<128x128xf32>
    %cst_34 = arith.constant 0.000000e+00 : f32
    %50 = vector.broadcast %cst_34 : f32 to vector<128x128xf32>
    %51 = arith.minimumf %47, %50 : vector<128x128xf32>
    %52 = math.exp %51 : vector<128x128xf32>
    %cst_35 = arith.constant 1.000000e+00 : f32
    %53 = vector.broadcast %cst_35 : f32 to vector<128x128xf32>
    %54 = arith.subf %52, %53 : vector<128x128xf32>
    %55 = arith.select %49, %47, %54 : vector<128x128xi1>, vector<128x128xf32>
    %c0_36 = arith.constant 0 : index
    %c0_37 = arith.constant 0 : index
    %56 = vector.load %arg7[%c0_36, %c0_37] : memref<128x128xbf16, #tpu.memory_space<vmem>>, vector<128x128xbf16>
    %cst_38 = arith.constant dense<0.000000e+00> : vector<128x128xf32>
    %57 = tpu.matmul %0, %56, %cst_38 {dimension_numbers = #tpu.dot_dimension_numbers<[1], [0], [0], [1], [0, 0, 1, 1], [], []>} : vector<128x128xbf16>, vector<128x128xbf16>, vector<128x128xf32> -> vector<128x128xf32>
    %c0_39 = arith.constant 0 : index
    %c0_40 = arith.constant 0 : index
    %58 = vector.load %arg8[%c0_39, %c0_40] : memref<1x128xf32, #tpu.memory_space<vmem>>, vector<1x128xf32>
    %59 = vector.broadcast %58 : vector<1x128xf32> to vector<128x128xf32>
    %60 = arith.addf %57, %59 : vector<128x128xf32>
    %61 = arith.addf %55, %60 : vector<128x128xf32>
    %cst_41 = arith.constant 0.000000e+00 : f32
    %62 = vector.broadcast %cst_41 : f32 to vector<128x128xf32>
    %63 = arith.cmpf ogt, %61, %62 : vector<128x128xf32>
    %cst_42 = arith.constant 0.000000e+00 : f32
    %64 = vector.broadcast %cst_42 : f32 to vector<128x128xf32>
    %65 = arith.minimumf %61, %64 : vector<128x128xf32>
    %66 = math.exp %65 : vector<128x128xf32>
    %cst_43 = arith.constant 1.000000e+00 : f32
    %67 = vector.broadcast %cst_43 : f32 to vector<128x128xf32>
    %68 = arith.subf %66, %67 : vector<128x128xf32>
    %69 = arith.select %63, %61, %68 : vector<128x128xi1>, vector<128x128xf32>
    %c0_44 = arith.constant 0 : index
    %c0_45 = arith.constant 0 : index
    %70 = vector.load %arg9[%c0_44, %c0_45] : memref<128x128xf32, #tpu.memory_space<vmem>>, vector<128x128xf32>
    tpu.vector_store %arg9[%c0_44, %c0_45], %69 {strides = array<i32>} : memref<128x128xf32, #tpu.memory_space<vmem>>, vector<128x128xf32>,
    return
  }
  func.func @transform_0(%arg0: i32) -> (i32, i32) {
    %c0_i32 = arith.constant 0 : i32
    %c0_i32_0 = arith.constant 0 : i32
    %c0_i32_1 = arith.constant 0 : i32
    return %c0_i32, %c0_i32_0 : i32, i32
  }
  func.func @transform_1(%arg0: i32) -> (i32, i32) {
    %c0_i32 = arith.constant 0 : i32
    %c0_i32_0 = arith.constant 0 : i32
    %c0_i32_1 = arith.constant 0 : i32
    return %c0_i32, %c0_i32_0 : i32, i32
  }
  func.func @transform_2(%arg0: i32) -> (i32, i32) {
    %c0_i32 = arith.constant 0 : i32
    %c0_i32_0 = arith.constant 0 : i32
    %c0_i32_1 = arith.constant 0 : i32
    return %c0_i32, %c0_i32_0 : i32, i32
  }
  func.func @transform_3(%arg0: i32) -> (i32, i32) {
    %c0_i32 = arith.constant 0 : i32
    %c0_i32_0 = arith.constant 0 : i32
    %c0_i32_1 = arith.constant 0 : i32
    return %c0_i32, %c0_i32_0 : i32, i32
  }
  func.func @transform_4(%arg0: i32) -> (i32, i32) {
    %c0_i32 = arith.constant 0 : i32
    %c0_i32_0 = arith.constant 0 : i32
    %c0_i32_1 = arith.constant 0 : i32
    return %c0_i32, %c0_i32_0 : i32, i32
  }
  func.func @transform_5(%arg0: i32) -> (i32, i32) {
    %c0_i32 = arith.constant 0 : i32
    %c0_i32_0 = arith.constant 0 : i32
    %c0_i32_1 = arith.constant 0 : i32
    return %c0_i32, %c0_i32_0 : i32, i32
  }
  func.func @transform_6(%arg0: i32) -> (i32, i32) {
    %c0_i32 = arith.constant 0 : i32
    %c0_i32_0 = arith.constant 0 : i32
    %c0_i32_1 = arith.constant 0 : i32
    return %c0_i32, %c0_i32_0 : i32, i32
  }
  func.func @transform_7(%arg0: i32) -> (i32, i32) {
    %c0_i32 = arith.constant 0 : i32
    %c0_i32_0 = arith.constant 0 : i32
    %c0_i32_1 = arith.constant 0 : i32
    return %c0_i32, %c0_i32_0 : i32, i32
  }
  func.func @transform_8(%arg0: i32) -> (i32, i32) {
    %c0_i32 = arith.constant 0 : i32
    %c0_i32_0 = arith.constant 0 : i32
    %c0_i32_1 = arith.constant 0 : i32
    return %c0_i32, %c0_i32_0 : i32, i32
  }
}

</mosaic_0001>

<bundles_post_ra>
// kernel: tpu_custom_call.1
= control target key start
LH: loop header
LB: loop body
LE: loop exit
PB: predicated region body
PF: predicated region fallthrough
CT: control target
= control target key end

     0   :  { %13 = vsyncpa [#allocation4], 0  ;;  %s5154_s0 = inlined_call_operand.hbm [shape: bf16[128,384], index: 0, kind: input, shape index: {}]   ;;  %s5155_s1 = inlined_call_operand.hbm [shape: bf16[128,128], index: 1, kind: input, shape index: {}]   ;;  %s5156_s2 = inlined_call_operand.hbm [shape: bf16[128,512], index: 2, kind: input, shape index: {}]   ;;  %s5157_s3 = inlined_call_operand.vmem [shape: f32[1,128], index: 3, kind: input, shape index: {}]   ;;  %s5158_s4 = inlined_call_operand.hbm [shape: bf16[128,512], index: 4, kind: input, shape index: {}]   ;;  %s5159_s5 = inlined_call_operand.vmem [shape: f32[1,128], index: 5, kind: input, shape index: {}]   ;;  %s5160_s6 = inlined_call_operand.hbm [shape: bf16[128,128], index: 6, kind: input, shape index: {}]   ;;  %s5161_s7 = inlined_call_operand.vmem [shape: f32[1,128], index: 7, kind: input, shape index: {}]   ;;  %s5162_s8 = inlined_call_operand.hbm [shape: f32[128,128], index: 8, kind: output, shape index: {}]  }
   0x1   :  { %14 = vsyncpa [#allocation7], 0 }
   0x2   :  { %15 = vsyncpa [#allocation10], 0 }
   0x3   :  { %16 = vsyncpa [#allocation5], 0  ;;  %s4628_s27 = smov [#allocation6]  }
   0x4   :  { %s34_s28 = sshll.u32 %s4628_s27, 4  ;;  %s35_s28 = int_to_ptr.vmem [resolvable:$true] %s34_s28 }
   0x5   :  { %s4508_s29 = scalar_lea.vmem %s35_s28, 1024  ;;  %p4513_p1 = scmp.lt.s32.totalorder %s35_s28, %s35_s28 }
   0x6   :  { %p4509_p0 = scmp.ne.s32.totalorder %s35_s28, %s4508_s29  ;;  %p4514_p2 = scmp.lt.s32.totalorder %s4508_s29, %s4508_s29 }
   0x8   :  { %p4515_p3 = por %p4514_p2, %p4513_p1 }
   0xa   :  { %p4516_p4 = pnand %p4515_p3, %p4509_p0 }
   0xc   :  { %4519 = shalt.err (!%p4516_p4)
}
   0xd   :  { %s4629_s30 = smov 64   ;;  %s4630_s9 = smov 4  }
   0xe   :  { %40 = dma.hbm_to_vmem [thread:$0]  %s5155_s1, 1024, %s35_s28, [#allocation7], %s4629_s30, %s4629_s30, %s4630_s9  }
   0xf   :  { %s4631_s12 = smov [#allocation9]   ;;  %s4632_s14 = smov [#allocation3]  }
  0x10   :  { %s60_s13 = sshll.u32 %s4631_s12, 4  ;;  %s22_s15 = sshll.u32 %s4632_s14, 4  ;;  %s61_s13 = int_to_ptr.vmem [resolvable:$true] %s60_s13  ;;  %s23_s15 = int_to_ptr.vmem [resolvable:$true] %s22_s15 }
  0x11   :  { %s4528_s16 = scalar_lea.vmem %s61_s13, 4096  ;;  %p4533_p6 = scmp.lt.s32.totalorder %s61_s13, %s61_s13 }
  0x12   :  { %p4529_p5 = scmp.ne.s32.totalorder %s61_s13, %s4528_s16  ;;  %p4534_p7 = scmp.lt.s32.totalorder %s4528_s16, %s4528_s16 }
  0x14   :  { %p4535_p8 = por %p4534_p7, %p4533_p6 }
  0x16   :  { %p4536_p9 = pnand %p4535_p8, %p4529_p5 }
  0x18   :  { %4539 = shalt.err (!%p4536_p9)
}
  0x19   :  { %s4633_s17 = smov 256   ;;  %s4634_s18 = smov 16  }
  0x1a   :  { %66 = dma.hbm_to_vmem [thread:$0]  %s5158_s4, 4096, %s61_s13, [#allocation10], %s4633_s17, %s4633_s17, %s4634_s18  }
  0x1b   :  { %s4548_s1 = scalar_lea.vmem %s23_s15, 3072  ;;  %p4553_p11 = scmp.lt.s32.totalorder %s23_s15, %s23_s15 }
  0x1c   :  { %p4549_p10 = scmp.ne.s32.totalorder %s23_s15, %s4548_s1  ;;  %p4554_p12 = scmp.lt.s32.totalorder %s4548_s1, %s4548_s1 }
  0x1e   :  { %p4555_p13 = por %p4554_p12, %p4553_p11 }
  0x20   :  { %p4556_p0 = pnand %p4555_p13, %p4549_p10 }
  0x22   :  { %4559 = shalt.err (!%p4556_p0)
}
  0x23   :  { %s4635_s21 = smov 192   ;;  %s4636_s22 = smov 12  }
  0x24   :  { %28 = dma.hbm_to_vmem [thread:$0]  %s5154_s0, 3072, %s23_s15, [#allocation4], %s4635_s21, %s4635_s21, %s4636_s22  }
  0x25   :  { %s4637_s25 = smov [#allocation8]   ;;  %s4638_s27 = smov [#allocation11]  }
  0x26   :  { %s46_s26 = sshll.u32 %s4637_s25, 4  ;;  %s74_s28 = sshll.u32 %s4638_s27, 4  ;;  %s47_s26 = int_to_ptr.vmem [resolvable:$true] %s46_s26  ;;  %s75_s28 = int_to_ptr.vmem [resolvable:$true] %s74_s28 }
  0x27   :  { %s4568_s4 = scalar_lea.vmem %s47_s26, 4096  ;;  %p4573_p2 = scmp.lt.s32.totalorder %s47_s26, %s47_s26 }
  0x28   :  { %p4569_p1 = scmp.ne.s32.totalorder %s47_s26, %s4568_s4  ;;  %p4574_p3 = scmp.lt.s32.totalorder %s4568_s4, %s4568_s4 }
  0x2a   :  { %p4575_p4 = por %p4574_p3, %p4573_p2 }
  0x2c   :  { %p4576_p5 = pnand %p4575_p4, %p4569_p1 }
  0x2e   :  { %4579 = shalt.err (!%p4576_p5)
}
  0x2f   :  { %52 = dma.hbm_to_vmem [thread:$0]  %s5156_s2, 4096, %s47_s26, [#allocation7], %s4633_s17, %s4633_s17, %s4634_s18  }
  0x30   :  { %s4588_s11 = scalar_lea.vmem %s75_s28, 1024  ;;  %p4593_p7 = scmp.lt.s32.totalorder %s75_s28, %s75_s28 }
  0x31   :  { %p4589_p6 = scmp.ne.s32.totalorder %s75_s28, %s4588_s11  ;;  %p4594_p8 = scmp.lt.s32.totalorder %s4588_s11, %s4588_s11 }
  0x33   :  { %p4595_p9 = por %p4594_p8, %p4593_p7 }
  0x35   :  { %p4596_p10 = pnand %p4595_p9, %p4589_p6 }
  0x37   :  { %4599 = shalt.err (!%p4596_p10)
}
  0x38   :  { %80 = dma.hbm_to_vmem [thread:$0]  %s5160_s6, 1024, %s75_s28, [#allocation10], %s4629_s30, %s4629_s30, %s4630_s9  }
  0x39   :  { %4620 = dma.done.wait [#allocation4], 3072  }
  0x3a   :  { %4621 = vsyncadd [#allocation4], 4294964224 }
  0x3b   :  { %4622 = dma.done.wait [#allocation7], 5120  }
  0x3c   :  { %4623 = vsyncadd [#allocation7], 4294962176 }
  0x3d   :  { %4624 = dma.done.wait [#allocation10], 5120  }
  0x3e   :  { %4625 = vsyncadd [#allocation10], 4294962176  ;;  %v4639_v0 = vmov 0   ;;  %v4172_v1 = vld [vmem:[#allocation8 + $0xe4] ss:$16 sps:$4 sm:$0xff]   ;;  %v4221_v34 = vld [vmem:[#allocation6 + $0x8] sm:$0xff]  }
  0x3f   :  { %387 = vmatprep.mubr.bf16.mxu0 %v4639_v0  ;;  %500 = vmatprep.mubr.bf16.mxu1 %v4639_v0  ;;  %v4174_v2 = vld [vmem:[#allocation8 + $0xec] ss:$16 sps:$4 sm:$0xff]   ;;  %v4176_v3 = vld [vmem:[#allocation8 + $0xe0] ss:$16 sps:$4 sm:$0xff]   ;;  %v4177_v4 = vld [vmem:[#allocation8 + $0xe8] ss:$16 sps:$4 sm:$0xff]  }
  0x40   :  { %355 = vmatprep.subr.bf16.mxu0 %v4172_v1  ;;  %468 = vmatprep.subr.bf16.mxu1 %v4174_v2  ;;  %v4178_v5 = vld [vmem:[#allocation8 + $0xc4] ss:$16 sps:$4 sm:$0xff]   ;;  %v4180_v6 = vld [vmem:[#allocation8 + $0xcc] ss:$16 sps:$4 sm:$0xff]   ;;  %v4182_v7 = vld [vmem:[#allocation8 + $0xc0] ss:$16 sps:$4 sm:$0xff]  }
  0x41   :  { %356 = vmatpush1.bf16.msra.mxu0 %v4176_v3  ;;  %469 = vmatpush1.bf16.msra.mxu1 %v4177_v4  ;;  %v4183_v8 = vld [vmem:[#allocation8 + $0xc8] ss:$16 sps:$4 sm:$0xff]   ;;  %v4184_v9 = vld [vmem:[#allocation8 + $0xa4] ss:$16 sps:$4 sm:$0xff]   ;;  %v4186_v10 = vld [vmem:[#allocation8 + $0xac] ss:$16 sps:$4 sm:$0xff]  }
  0x42   :  { %357 = vmatprep.subr.bf16.mxu0 %v4178_v5  ;;  %470 = vmatprep.subr.bf16.mxu1 %v4180_v6  ;;  %v4188_v11 = vld [vmem:[#allocation8 + $0xa0] ss:$16 sps:$4 sm:$0xff]   ;;  %v4189_v12 = vld [vmem:[#allocation8 + $0xa8] ss:$16 sps:$4 sm:$0xff]   ;;  %v4190_v13 = vld [vmem:[#allocation8 + $0x84] ss:$16 sps:$4 sm:$0xff]  }
  0x43   :  { %v4192_v14 = vld [vmem:[#allocation8 + $0x8c] ss:$16 sps:$4 sm:$0xff]   ;;  %v4194_v15 = vld [vmem:[#allocation8 + $0x80] ss:$16 sps:$4 sm:$0xff]   ;;  %v4195_v16 = vld [vmem:[#allocation8 + $0x88] ss:$16 sps:$4 sm:$0xff]  }
  0x44   :  { %v4196_v17 = vld [vmem:[#allocation8 + $0x64] ss:$16 sps:$4 sm:$0xff]   ;;  %v4198_v18 = vld [vmem:[#allocation8 + $0x6c] ss:$16 sps:$4 sm:$0xff]   ;;  %v4200_v19 = vld [vmem:[#allocation8 + $0x60] ss:$16 sps:$4 sm:$0xff]  }
  0x45   :  { %358 = vmatpush1.bf16.msra.mxu0 %v4182_v7  ;;  %471 = vmatpush1.bf16.msra.mxu1 %v4183_v8  ;;  %v4201_v20 = vld [vmem:[#allocation8 + $0x68] ss:$16 sps:$4 sm:$0xff]   ;;  %v4202_v21 = vld [vmem:[#allocation8 + $0x44] ss:$16 sps:$4 sm:$0xff]   ;;  %v4204_v22 = vld [vmem:[#allocation8 + $0x4c] ss:$16 sps:$4 sm:$0xff]  }
  0x46   :  { %359 = vmatprep.subr.bf16.mxu0 %v4184_v9  ;;  %472 = vmatprep.subr.bf16.mxu1 %v4186_v10  ;;  %v4206_v23 = vld [vmem:[#allocation8 + $0x40] ss:$16 sps:$4 sm:$0xff]   ;;  %v4207_v24 = vld [vmem:[#allocation8 + $0x48] ss:$16 sps:$4 sm:$0xff]   ;;  %v4208_v25 = vld [vmem:[#allocation8 + $0x24] ss:$16 sps:$4 sm:$0xff]  }
  0x47   :  { %v4210_v26 = vld [vmem:[#allocation8 + $0x2c] ss:$16 sps:$4 sm:$0xff]   ;;  %v4212_v27 = vld [vmem:[#allocation8 + $0x20] ss:$16 sps:$4 sm:$0xff]   ;;  %v4213_v28 = vld [vmem:[#allocation8 + $0x28] ss:$16 sps:$4 sm:$0xff]  }
  0x48   :  { %v4214_v29 = vld [vmem:[#allocation8 + $0x4] ss:$16 sps:$4 sm:$0xff]   ;;  %v4216_v30 = vld [vmem:[#allocation8 + $0xc] ss:$16 sps:$4 sm:$0xff]   ;;  %v4218_v31 = vld [vmem:[#allocation8] ss:$16 sps:$4 sm:$0xff]  }
  0x49   :  { %360 = vmatpush1.bf16.msra.mxu0 %v4188_v11  ;;  %473 = vmatpush1.bf16.msra.mxu1 %v4189_v12  ;;  %v4219_v32 = vld [vmem:[#allocation8 + $0x8] ss:$16 sps:$4 sm:$0xff]   ;;  %v4220_v33 = vld [vmem:[#allocation6] sm:$0xff]   ;;  %v4222_v35 = vld [vmem:[#allocation6 + $0x10] sm:$0xff]  }
  0x4a   :  { %361 = vmatprep.subr.bf16.mxu0 %v4190_v13  ;;  %474 = vmatprep.subr.bf16.mxu1 %v4192_v14  ;;  %v4223_v36 = vld [vmem:[#allocation6 + $0x18] sm:$0xff]   ;;  %v4224_v37 = vld [vmem:[#allocation6 + $0x20] sm:$0xff]   ;;  %v4225_v38 = vld [vmem:[#allocation6 + $0x28] sm:$0xff]  }
  0x4b   :  { %v4226_v39 = vld [vmem:[#allocation6 + $0x30] sm:$0xff]   ;;  %v4227_v40 = vld [vmem:[#allocation6 + $0x38] sm:$0xff]  }
  0x4c   :  { %v4254_v41 = vld [vmem:[#allocation3 + $0x4] ss:$12 sps:$4 sm:$0xff]   ;;  %v4255_v42 = vld [vmem:[#allocation3 + $0x8] ss:$12 sps:$4 sm:$0xff]  }
  0x4d   :  { %362 = vmatpush1.bf16.msra.mxu0 %v4194_v15  ;;  %475 = vmatpush1.bf16.msra.mxu1 %v4195_v16 }
  0x4e   :  { %363 = vmatprep.subr.bf16.mxu0 %v4196_v17  ;;  %476 = vmatprep.subr.bf16.mxu1 %v4198_v18 }
  0x51   :  { %364 = vmatpush1.bf16.msra.mxu0 %v4200_v19  ;;  %477 = vmatpush1.bf16.msra.mxu1 %v4201_v20 }
  0x52   :  { %365 = vmatprep.subr.bf16.mxu0 %v4202_v21  ;;  %478 = vmatprep.subr.bf16.mxu1 %v4204_v22 }
  0x55   :  { %366 = vmatpush1.bf16.msra.mxu0 %v4206_v23  ;;  %479 = vmatpush1.bf16.msra.mxu1 %v4207_v24 }
  0x56   :  { %367 = vmatprep.subr.bf16.mxu0 %v4208_v25  ;;  %480 = vmatprep.subr.bf16.mxu1 %v4210_v26 }
  0x59   :  { %368 = vmatpush1.bf16.msra.mxu0 %v4212_v27  ;;  %481 = vmatpush1.bf16.msra.mxu1 %v4213_v28 }
  0x5a   :  { %369 = vmatprep.subr.bf16.mxu0 %v4214_v29  ;;  %482 = vmatprep.subr.bf16.mxu1 %v4216_v30 }
  0x5d   :  { %370 = vmatpush1.bf16.msra.mxu0 %v4218_v31  ;;  %483 = vmatpush1.bf16.msra.mxu1 %v4219_v32 }
  0x60   :  { %388 = vmatmul.mubr.bf16.vlgmr.msra.gmra.mxu0 %v4220_v33  ;;  %501 = vmatmul.mubr.bf16.vlgmr.msra.gmra.mxu1 %v4220_v33 }
  0x61   :  { %397 = vmatprep.mubr.bf16.mxu0 %v4639_v0  ;;  %510 = vmatprep.mubr.bf16.mxu1 %v4639_v0 }
  0x68   :  { %398 = vmatmul.mubr.bf16.gmra.mxu0 %v4221_v34  ;;  %511 = vmatmul.mubr.bf16.gmra.mxu1 %v4221_v34 }
  0x69   :  { %407 = vmatprep.mubr.bf16.mxu0 %v4639_v0  ;;  %520 = vmatprep.mubr.bf16.mxu1 %v4639_v0 }
  0x70   :  { %408 = vmatmul.mubr.bf16.gmra.mxu0 %v4222_v35  ;;  %521 = vmatmul.mubr.bf16.gmra.mxu1 %v4222_v35 }
  0x71   :  { %417 = vmatprep.mubr.bf16.mxu0 %v4639_v0  ;;  %530 = vmatprep.mubr.bf16.mxu1 %v4639_v0 }
  0x78   :  { %418 = vmatmul.mubr.bf16.gmra.mxu0 %v4223_v36  ;;  %531 = vmatmul.mubr.bf16.gmra.mxu1 %v4223_v36 }
  0x79   :  { %427 = vmatprep.mubr.bf16.mxu0 %v4639_v0  ;;  %540 = vmatprep.mubr.bf16.mxu1 %v4639_v0 }
  0x80   :  { %428 = vmatmul.mubr.bf16.gmra.mxu0 %v4224_v37  ;;  %541 = vmatmul.mubr.bf16.gmra.mxu1 %v4224_v37 }
  0x81   :  { %437 = vmatprep.mubr.bf16.mxu0 %v4639_v0  ;;  %550 = vmatprep.mubr.bf16.mxu1 %v4639_v0 }
  0x88   :  { %438 = vmatmul.mubr.bf16.gmra.mxu0 %v4225_v38  ;;  %551 = vmatmul.mubr.bf16.gmra.mxu1 %v4225_v38 }
  0x89   :  { %447 = vmatprep.mubr.bf16.mxu0 %v4639_v0  ;;  %560 = vmatprep.mubr.bf16.mxu1 %v4639_v0 }
  0x90   :  { %448 = vmatmul.mubr.bf16.gmra.mxu0 %v4226_v39  ;;  %561 = vmatmul.mubr.bf16.gmra.mxu1 %v4226_v39 }
  0x91   :  { %457 = vmatprep.mubr.bf16.mxu0 %v4639_v0  ;;  %570 = vmatprep.mubr.bf16.mxu1 %v4639_v0 }
  0x98   :  { %458 = vmatmul.mubr.bf16.gmra.mxu0 %v4227_v40  ;;  %571 = vmatmul.mubr.bf16.gmra.mxu1 %v4227_v40 }
  0x99   :  { %1205 = vmatprep.mubr.bf16.mxu0 %v4254_v41  ;;  %4061 = vmatprep.mubr.bf16.mxu1 %v4255_v42 }
 0x120   :  { %v4725_v43 = vpop.f32.mrf.mxu0  ;;  %v502_v44 = vpop.f32.mrf.mxu1 }
 0x122   :  { %v391_v45 = vpop.f32.mrf.mxu0  ;;  %v504_v46 = vpop.f32.mrf.mxu1 }
 0x124   :  { %v4727_v47 = vpop.f32.mrf.mxu0  ;;  %v506_v48 = vpop.f32.mrf.mxu1 }
 0x125   :  { %v3626_v49 = vpack.c.bf16 %v506_v48, %v502_v44 }
 0x126   :  { %v395_v50 = vpop.f32.mrf.mxu0  ;;  %v508_v51 = vpop.f32.mrf.mxu1 }
 0x127   :  { %3830 = vst [vmem:[#allocation2 + $0x40] sm:$0xff] %v3626_v49   ;;  %v3586_v52 = vpack.c.bf16 %v395_v50, %v391_v45  ;;  %v3666_v53 = vpack.c.bf16 %v508_v51, %v504_v46 }
 0x128   :  { %v4729_v54 = vpop.f32.mrf.mxu0  ;;  %v512_v55 = vpop.f32.mrf.mxu1 }
 0x129   :  { %3587 = vst [vmem:[#allocation2] sm:$0xff] %v3586_v52   ;;  %3838 = vst [vmem:[#allocation2 + $0x80] sm:$0xff] %v3666_v53  }
 0x12a   :  { %v401_v56 = vpop.f32.mrf.mxu0  ;;  %v514_v57 = vpop.f32.mrf.mxu1 }
 0x12c   :  { %v4731_v58 = vpop.f32.mrf.mxu0  ;;  %v516_v59 = vpop.f32.mrf.mxu1 }
 0x12d   :  { %v3631_v60 = vpack.c.bf16 %v516_v59, %v512_v55 }
 0x12e   :  { %v405_v61 = vpop.f32.mrf.mxu0  ;;  %v518_v62 = vpop.f32.mrf.mxu1 }
 0x12f   :  { %3831 = vst [vmem:[#allocation2 + $0x48] sm:$0xff] %v3631_v60   ;;  %v3591_v63 = vpack.c.bf16 %v405_v61, %v401_v56  ;;  %v3671_v1 = vpack.c.bf16 %v518_v62, %v514_v57 }
 0x130   :  { %v4733_v2 = vpop.f32.mrf.mxu0  ;;  %v522_v3 = vpop.f32.mrf.mxu1 }
 0x131   :  { %3823 = vst [vmem:[#allocation2 + $0x8] sm:$0xff] %v3591_v63   ;;  %3839 = vst [vmem:[#allocation2 + $0x88] sm:$0xff] %v3671_v1  }
 0x132   :  { %v411_v4 = vpop.f32.mrf.mxu0  ;;  %v524_v5 = vpop.f32.mrf.mxu1 }
 0x134   :  { %v4735_v6 = vpop.f32.mrf.mxu0  ;;  %v526_v7 = vpop.f32.mrf.mxu1 }
 0x135   :  { %v3636_v8 = vpack.c.bf16 %v526_v7, %v522_v3 }
 0x136   :  { %v415_v9 = vpop.f32.mrf.mxu0  ;;  %v528_v10 = vpop.f32.mrf.mxu1 }
 0x137   :  { %3832 = vst [vmem:[#allocation2 + $0x50] sm:$0xff] %v3636_v8   ;;  %v3596_v11 = vpack.c.bf16 %v415_v9, %v411_v4  ;;  %v3676_v12 = vpack.c.bf16 %v528_v10, %v524_v5 }
 0x138   :  { %v4737_v13 = vpop.f32.mrf.mxu0  ;;  %v532_v14 = vpop.f32.mrf.mxu1 }
 0x139   :  { %3824 = vst [vmem:[#allocation2 + $0x10] sm:$0xff] %v3596_v11   ;;  %3840 = vst [vmem:[#allocation2 + $0x90] sm:$0xff] %v3676_v12  }
 0x13a   :  { %v421_v15 = vpop.f32.mrf.mxu0  ;;  %v534_v16 = vpop.f32.mrf.mxu1 }
 0x13c   :  { %v4739_v17 = vpop.f32.mrf.mxu0  ;;  %v536_v18 = vpop.f32.mrf.mxu1 }
 0x13d   :  { %v3641_v19 = vpack.c.bf16 %v536_v18, %v532_v14 }
 0x13e   :  { %v425_v20 = vpop.f32.mrf.mxu0  ;;  %v538_v21 = vpop.f32.mrf.mxu1 }
 0x13f   :  { %3833 = vst [vmem:[#allocation2 + $0x58] sm:$0xff] %v3641_v19   ;;  %v3601_v22 = vpack.c.bf16 %v425_v20, %v421_v15  ;;  %v3681_v23 = vpack.c.bf16 %v538_v21, %v534_v16 }
 0x140   :  { %v4741_v24 = vpop.f32.mrf.mxu0  ;;  %v542_v25 = vpop.f32.mrf.mxu1 }
 0x141   :  { %3825 = vst [vmem:[#allocation2 + $0x18] sm:$0xff] %v3601_v22   ;;  %3841 = vst [vmem:[#allocation2 + $0x98] sm:$0xff] %v3681_v23  }
 0x142   :  { %v431_v26 = vpop.f32.mrf.mxu0  ;;  %v544_v27 = vpop.f32.mrf.mxu1 }
 0x144   :  { %v4743_v28 = vpop.f32.mrf.mxu0  ;;  %v546_v29 = vpop.f32.mrf.mxu1 }
 0x145   :  { %v3646_v30 = vpack.c.bf16 %v546_v29, %v542_v25 }
 0x146   :  { %v435_v31 = vpop.f32.mrf.mxu0  ;;  %v548_v32 = vpop.f32.mrf.mxu1 }
 0x147   :  { %3834 = vst [vmem:[#allocation2 + $0x60] sm:$0xff] %v3646_v30   ;;  %v3606_v33 = vpack.c.bf16 %v435_v31, %v431_v26  ;;  %v3686_v34 = vpack.c.bf16 %v548_v32, %v544_v27  ;;  %v4240_v26 = vld [vmem:[#allocation2 + $0x58] sm:$0xff]   ;;  %v4243_v30 = vld [vmem:[#allocation2 + $0x50] sm:$0xff]  }
 0x148   :  { %v4745_v35 = vpop.f32.mrf.mxu0  ;;  %v552_v36 = vpop.f32.mrf.mxu1  ;;  %v4241_v27 = vld [vmem:[#allocation2 + $0x98] sm:$0xff]   ;;  %v4244_v31 = vld [vmem:[#allocation2 + $0x90] sm:$0xff]  }
 0x149   :  { %3826 = vst [vmem:[#allocation2 + $0x20] sm:$0xff] %v3606_v33   ;;  %3842 = vst [vmem:[#allocation2 + $0xa0] sm:$0xff] %v3686_v34   ;;  %v4242_v29 = vld [vmem:[#allocation2 + $0x18] sm:$0xff]   ;;  %v4245_v32 = vld [vmem:[#allocation2 + $0x10] sm:$0xff]  }
 0x14a   :  { %v441_v37 = vpop.f32.mrf.mxu0  ;;  %v554_v38 = vpop.f32.mrf.mxu1  ;;  %v4246_v33 = vld [vmem:[#allocation2 + $0x48] sm:$0xff]  }
 0x14b   :  { %v4247_v34 = vld [vmem:[#allocation2 + $0x88] sm:$0xff]  }
 0x14c   :  { %v4747_v39 = vpop.f32.mrf.mxu0  ;;  %v556_v40 = vpop.f32.mrf.mxu1 }
 0x14d   :  { %v3651_v41 = vpack.c.bf16 %v556_v40, %v552_v36  ;;  %v4248_v36 = vld [vmem:[#allocation2 + $0x8] sm:$0xff]   ;;  %v4251_v40 = vld [vmem:[#allocation2] sm:$0xff]  }
 0x14e   :  { %v445_v42 = vpop.f32.mrf.mxu0  ;;  %v558_v44 = vpop.f32.mrf.mxu1  ;;  %v4237_v22 = vld [vmem:[#allocation2 + $0x60] sm:$0xff]  }
 0x14f   :  { %3835 = vst [vmem:[#allocation2 + $0x68] sm:$0xff] %v3651_v41   ;;  %v3611_v45 = vpack.c.bf16 %v445_v42, %v441_v37  ;;  %v3691_v46 = vpack.c.bf16 %v558_v44, %v554_v38  ;;  %v4249_v37 = vld [vmem:[#allocation2 + $0x40] sm:$0xff]   ;;  %v4257_v42 = vld [vmem:[#allocation3 + $0x1c] ss:$12 sps:$4 sm:$0xff]  }
 0x150   :  { %v4749_v48 = vpop.f32.mrf.mxu0  ;;  %v562_v49 = vpop.f32.mrf.mxu1  ;;  %v4238_v23 = vld [vmem:[#allocation2 + $0xa0] sm:$0xff]  }
 0x151   :  { %3827 = vst [vmem:[#allocation2 + $0x28] sm:$0xff] %v3611_v45   ;;  %3843 = vst [vmem:[#allocation2 + $0xa8] sm:$0xff] %v3691_v46   ;;  %v4239_v25 = vld [vmem:[#allocation2 + $0x20] sm:$0xff]  }
 0x152   :  { %v451_v50 = vpop.f32.mrf.mxu0  ;;  %v564_v51 = vpop.f32.mrf.mxu1  ;;  %v4250_v38 = vld [vmem:[#allocation2 + $0x80] sm:$0xff]  }
 0x153   :  { %v4252_v41 = vld [vmem:[#allocation3] ss:$12 sps:$4 sm:$0xff]   ;;  %v4260_v45 = vld [vmem:[#allocation3 + $0x38] ss:$12 sps:$4 sm:$0xff]  }
 0x154   :  { %v4751_v52 = vpop.f32.mrf.mxu0  ;;  %v566_v53 = vpop.f32.mrf.mxu1  ;;  %v4256_v44 = vld [vmem:[#allocation3 + $0x20] ss:$12 sps:$4 sm:$0xff]   ;;  %v4259_v46 = vld [vmem:[#allocation3 + $0x18] ss:$12 sps:$4 sm:$0xff]  }
 0x155   :  { %v3656_v55 = vpack.c.bf16 %v566_v53, %v562_v49  ;;  %v4262_v49 = vld [vmem:[#allocation3 + $0x34] ss:$12 sps:$4 sm:$0xff]   ;;  %v4264_v53 = vld [vmem:[#allocation3 + $0x30] ss:$12 sps:$4 sm:$0xff]  }
 0x156   :  { %v455_v56 = vpop.f32.mrf.mxu0  ;;  %v568_v57 = vpop.f32.mrf.mxu1  ;;  %v4234_v19 = vld [vmem:[#allocation2 + $0x68] sm:$0xff]  }
 0x157   :  { %3836 = vst [vmem:[#allocation2 + $0x70] sm:$0xff] %v3656_v55   ;;  %v3616_v59 = vpack.c.bf16 %v455_v56, %v451_v50  ;;  %v3696_v60 = vpack.c.bf16 %v568_v57, %v564_v51  ;;  %v4261_v50 = vld [vmem:[#allocation3 + $0x50] ss:$12 sps:$4 sm:$0xff]   ;;  %v4268_v51 = vld [vmem:[#allocation3 + $0x68] ss:$12 sps:$4 sm:$0xff]  }
 0x158   :  { %v4753_v61 = vpop.f32.mrf.mxu0  ;;  %v572_v62 = vpop.f32.mrf.mxu1  ;;  %v4235_v20 = vld [vmem:[#allocation2 + $0xa8] sm:$0xff]   ;;  %v4276_v57 = vld [vmem:[#allocation3 + $0x98] ss:$12 sps:$4 sm:$0xff]  }
 0x159   :  { %3828 = vst [vmem:[#allocation2 + $0x30] sm:$0xff] %v3616_v59   ;;  %3844 = vst [vmem:[#allocation2 + $0xb0] sm:$0xff] %v3696_v60   ;;  %v4236_v21 = vld [vmem:[#allocation2 + $0x28] sm:$0xff]   ;;  %v4270_v60 = vld [vmem:[#allocation3 + $0x64] ss:$12 sps:$4 sm:$0xff]  }
 0x15a   :  { %v461_v63 = vpop.f32.mrf.mxu0  ;;  %v574_v1 = vpop.f32.mrf.mxu1  ;;  %v4265_v55 = vld [vmem:[#allocation3 + $0x4c] ss:$12 sps:$4 sm:$0xff]   ;;  %v4267_v59 = vld [vmem:[#allocation3 + $0x48] ss:$12 sps:$4 sm:$0xff]  }
 0x15b   :  { %v4269_v56 = vld [vmem:[#allocation3 + $0x80] ss:$12 sps:$4 sm:$0xff]  }
 0x15c   :  { %v4755_v3 = vpop.f32.mrf.mxu0  ;;  %v576_v4 = vpop.f32.mrf.mxu1 }
 0x15d   :  { %v3661_v5 = vpack.c.bf16 %v576_v4, %v572_v62  ;;  %v4277_v62 = vld [vmem:[#allocation3 + $0xb0] ss:$12 sps:$4 sm:$0xff]   ;;  %v4275_v4 = vld [vmem:[#allocation3 + $0x78] ss:$12 sps:$4 sm:$0xff]  }
 0x15e   :  { %v465_v7 = vpop.f32.mrf.mxu0  ;;  %v578_v8 = vpop.f32.mrf.mxu1  ;;  %v4231_v12 = vld [vmem:[#allocation2 + $0x70] sm:$0xff]  }
 0x15f   :  { %3837 = vst [vmem:[#allocation2 + $0x78] sm:$0xff] %v3661_v5   ;;  %v3621_v9 = vpack.c.bf16 %v465_v7, %v461_v63  ;;  %v3701_v10 = vpack.c.bf16 %v578_v8, %v574_v1  ;;  %v4272_v63 = vld [vmem:[#allocation3 + $0x60] ss:$12 sps:$4 sm:$0xff]   ;;  %v4273_v1 = vld [vmem:[#allocation3 + $0x7c] ss:$12 sps:$4 sm:$0xff]  }
 0x160   :  { %v4232_v16 = vld [vmem:[#allocation2 + $0xb0] sm:$0xff]   ;;  %v4281_v8 = vld [vmem:[#allocation3 + $0xac] ss:$12 sps:$4 sm:$0xff]  }
 0x161   :  { %3829 = vst [vmem:[#allocation2 + $0x38] sm:$0xff] %v3621_v9   ;;  %3845 = vst [vmem:[#allocation2 + $0xb8] sm:$0xff] %v3701_v10   ;;  %v4233_v18 = vld [vmem:[#allocation2 + $0x30] sm:$0xff]  }
 0x162   :  { %v4278_v5 = vld [vmem:[#allocation3 + $0x94] ss:$12 sps:$4 sm:$0xff]   ;;  %v4280_v7 = vld [vmem:[#allocation3 + $0x90] ss:$12 sps:$4 sm:$0xff]  }
 0x163   :  { %v4283_v9 = vld [vmem:[#allocation3 + $0xa8] ss:$12 sps:$4 sm:$0xff]  }
 0x164   :  { %v4286_v10 = vld [vmem:[#allocation9 + $0xe4] ss:$16 sps:$4 sm:$0xff]  }
 0x166   :  { %v4228_v11 = vld [vmem:[#allocation2 + $0x78] sm:$0xff]  }
 0x167   :  { %3869 = vmatprep.subr.bf16.mxu0 %v4228_v11  ;;  %v4289_v11 = vld [vmem:[#allocation9 + $0xec] ss:$16 sps:$4 sm:$0xff]  }
 0x168   :  { %v4229_v14 = vld [vmem:[#allocation2 + $0x38] sm:$0xff]  }
 0x169   :  { %v4230_v15 = vld [vmem:[#allocation2 + $0xb8] sm:$0xff]   ;;  %3870 = vmatpush3.bf16.msra.mxu0 %v4229_v14 }
 0x16a   :  { %4045 = vmatprep.subr.bf16.mxu1 %v4230_v15  ;;  %3871 = vmatprep.subr.bf16.mxu0 %v4231_v12  ;;  %v4284_v12 = vld [vmem:[#allocation9 + $0xe0] ss:$16 sps:$4 sm:$0xff]   ;;  %v4287_v14 = vld [vmem:[#allocation9 + $0xe8] ss:$16 sps:$4 sm:$0xff]  }
 0x16b   :  { %4046 = vmatpush3.bf16.msra.mxu1 %v4230_v15  ;;  %v4292_v15 = vld [vmem:[#allocation9 + $0xc4] ss:$16 sps:$4 sm:$0xff]  }
 0x16c   :  { %4047 = vmatprep.subr.bf16.mxu1 %v4232_v16 }
 0x16d   :  { %3872 = vmatpush3.bf16.msra.mxu0 %v4233_v18  ;;  %v4290_v18 = vld [vmem:[#allocation9 + $0xc0] ss:$16 sps:$4 sm:$0xff]  }
 0x16e   :  { %3873 = vmatprep.subr.bf16.mxu0 %v4234_v19  ;;  %v4293_v19 = vld [vmem:[#allocation9 + $0xc8] ss:$16 sps:$4 sm:$0xff]  }
 0x16f   :  { %4048 = vmatpush3.bf16.msra.mxu1 %v4232_v16  ;;  %v4295_v16 = vld [vmem:[#allocation9 + $0xcc] ss:$16 sps:$4 sm:$0xff]  }
 0x170   :  { %4049 = vmatprep.subr.bf16.mxu1 %v4235_v20 }
 0x171   :  { %3874 = vmatpush3.bf16.msra.mxu0 %v4236_v21  ;;  %v4301_v21 = vld [vmem:[#allocation9 + $0xac] ss:$16 sps:$4 sm:$0xff]  }
 0x172   :  { %3875 = vmatprep.subr.bf16.mxu0 %v4237_v22  ;;  %v4296_v22 = vld [vmem:[#allocation9 + $0xa0] ss:$16 sps:$4 sm:$0xff]  }
 0x173   :  { %4050 = vmatpush3.bf16.msra.mxu1 %v4235_v20  ;;  %v4298_v20 = vld [vmem:[#allocation9 + $0xa4] ss:$16 sps:$4 sm:$0xff]  }
 0x174   :  { %4051 = vmatprep.subr.bf16.mxu1 %v4238_v23 }
 0x175   :  { %3876 = vmatpush3.bf16.msra.mxu0 %v4239_v25  ;;  %v4304_v25 = vld [vmem:[#allocation9 + $0x84] ss:$16 sps:$4 sm:$0xff]  }
 0x176   :  { %3877 = vmatprep.subr.bf16.mxu0 %v4240_v26  ;;  %v4307_v26 = vld [vmem:[#allocation9 + $0x8c] ss:$16 sps:$4 sm:$0xff]  }
 0x177   :  { %4052 = vmatpush3.bf16.msra.mxu1 %v4238_v23  ;;  %v4299_v23 = vld [vmem:[#allocation9 + $0xa8] ss:$16 sps:$4 sm:$0xff]  }
 0x178   :  { %4053 = vmatprep.subr.bf16.mxu1 %v4241_v27 }
 0x179   :  { %3878 = vmatpush3.bf16.msra.mxu0 %v4242_v29  ;;  %v4305_v29 = vld [vmem:[#allocation9 + $0x88] ss:$16 sps:$4 sm:$0xff]  }
 0x17a   :  { %3879 = vmatprep.subr.bf16.mxu0 %v4243_v30  ;;  %v4310_v30 = vld [vmem:[#allocation9 + $0x64] ss:$16 sps:$4 sm:$0xff]  }
 0x17b   :  { %4054 = vmatpush3.bf16.msra.mxu1 %v4241_v27  ;;  %v4302_v27 = vld [vmem:[#allocation9 + $0x80] ss:$16 sps:$4 sm:$0xff]  }
 0x17c   :  { %4055 = vmatprep.subr.bf16.mxu1 %v4244_v31 }
 0x17d   :  { %3880 = vmatpush3.bf16.msra.mxu0 %v4245_v32  ;;  %v4308_v32 = vld [vmem:[#allocation9 + $0x60] ss:$16 sps:$4 sm:$0xff]  }
 0x17e   :  { %3881 = vmatprep.subr.bf16.mxu0 %v4246_v33  ;;  %v4311_v33 = vld [vmem:[#allocation9 + $0x68] ss:$16 sps:$4 sm:$0xff]  }
 0x17f   :  { %4056 = vmatpush3.bf16.msra.mxu1 %v4244_v31  ;;  %v4313_v31 = vld [vmem:[#allocation9 + $0x6c] ss:$16 sps:$4 sm:$0xff]  }
 0x180   :  { %4057 = vmatprep.subr.bf16.mxu1 %v4247_v34 }
 0x181   :  { %3882 = vmatpush3.bf16.msra.mxu0 %v4248_v36  ;;  %v4319_v36 = vld [vmem:[#allocation9 + $0x4c] ss:$16 sps:$4 sm:$0xff]  }
 0x182   :  { %3883 = vmatprep.subr.bf16.mxu0 %v4249_v37  ;;  %v4314_v37 = vld [vmem:[#allocation9 + $0x40] ss:$16 sps:$4 sm:$0xff]  }
 0x183   :  { %4058 = vmatpush3.bf16.msra.mxu1 %v4247_v34  ;;  %v4316_v34 = vld [vmem:[#allocation9 + $0x44] ss:$16 sps:$4 sm:$0xff]  }
 0x184   :  { %4059 = vmatprep.subr.bf16.mxu1 %v4250_v38 }
 0x185   :  { %3884 = vmatpush3.bf16.msra.mxu0 %v4251_v40  ;;  %v4322_v40 = vld [vmem:[#allocation9 + $0x24] ss:$16 sps:$4 sm:$0xff]  }
 0x186   :  { %1815 = vmatprep.subr.bf16.mxu0 %v4289_v11 }
 0x187   :  { %4060 = vmatpush3.bf16.msra.mxu1 %v4250_v38  ;;  %v4317_v38 = vld [vmem:[#allocation9 + $0x48] ss:$16 sps:$4 sm:$0xff]  }
 0x188   :  { %1206 = vmatmul.mubr.bf16.vlgmr.msra.gmra.mxu0 %v4252_v41  ;;  %1702 = vmatprep.subr.bf16.mxu1 %v4286_v10  ;;  %v4325_v41 = vld [vmem:[#allocation9 + $0x2c] ss:$16 sps:$4 sm:$0xff]  }
 0x189   :  { %1213 = vmatprep.mubr.bf16.mxu0 %v4257_v42  ;;  %1816 = vmatpush1.bf16.msra.mxu0 %v4287_v14  ;;  %v4320_v42 = vld [vmem:[#allocation9 + $0x20] ss:$16 sps:$4 sm:$0xff]  }
 0x18a   :  { %4062 = vmatmul.mubr.bf16.vlgmr.msra.gmra.mxu1 %v4256_v44  ;;  %1817 = vmatprep.subr.bf16.mxu0 %v4295_v16  ;;  %v4323_v44 = vld [vmem:[#allocation9 + $0x28] ss:$16 sps:$4 sm:$0xff]  }
 0x18b   :  { %4065 = vmatprep.mubr.bf16.mxu1 %v4260_v45  ;;  %1703 = vmatpush1.bf16.msra.mxu1 %v4284_v12  ;;  %v4328_v45 = vld [vmem:[#allocation9 + $0x4] ss:$16 sps:$4 sm:$0xff]  }
 0x18c   :  { %1704 = vmatprep.subr.bf16.mxu1 %v4292_v15 }
 0x18d   :  { %1818 = vmatpush1.bf16.msra.mxu0 %v4293_v19 }
 0x18e   :  { %1819 = vmatprep.subr.bf16.mxu0 %v4301_v21 }
 0x18f   :  { %1705 = vmatpush1.bf16.msra.mxu1 %v4290_v18 }
 0x190   :  { %1214 = vmatmul.mubr.bf16.gmra.mxu0 %v4259_v46  ;;  %1706 = vmatprep.subr.bf16.mxu1 %v4298_v20  ;;  %v4331_v46 = vld [vmem:[#allocation9 + $0xc] ss:$16 sps:$4 sm:$0xff]  }
 0x191   :  { %1221 = vmatprep.mubr.bf16.mxu0 %v4262_v49  ;;  %1820 = vmatpush1.bf16.msra.mxu0 %v4299_v23  ;;  %v4326_v49 = vld [vmem:[#allocation9] ss:$16 sps:$4 sm:$0xff]  }
 0x192   :  { %4066 = vmatmul.mubr.bf16.gmra.mxu1 %v4261_v50  ;;  %1821 = vmatprep.subr.bf16.mxu0 %v4307_v26  ;;  %v4329_v50 = vld [vmem:[#allocation9 + $0x8] ss:$16 sps:$4 sm:$0xff]  }
 0x193   :  { %4069 = vmatprep.mubr.bf16.mxu1 %v4268_v51  ;;  %1707 = vmatpush1.bf16.msra.mxu1 %v4296_v22 }
 0x194   :  { %1708 = vmatprep.subr.bf16.mxu1 %v4304_v25 }
 0x195   :  { %1822 = vmatpush1.bf16.msra.mxu0 %v4305_v29 }
 0x196   :  { %1823 = vmatprep.subr.bf16.mxu0 %v4313_v31 }
 0x197   :  { %1709 = vmatpush1.bf16.msra.mxu1 %v4302_v27 }
 0x198   :  { %1222 = vmatmul.mubr.bf16.gmra.mxu0 %v4264_v53  ;;  %1710 = vmatprep.subr.bf16.mxu1 %v4310_v30 }
 0x199   :  { %1229 = vmatprep.mubr.bf16.mxu0 %v4265_v55  ;;  %1824 = vmatpush1.bf16.msra.mxu0 %v4311_v33 }
 0x19a   :  { %4070 = vmatmul.mubr.bf16.gmra.mxu1 %v4269_v56  ;;  %1825 = vmatprep.subr.bf16.mxu0 %v4319_v36 }
 0x19b   :  { %4073 = vmatprep.mubr.bf16.mxu1 %v4276_v57  ;;  %1711 = vmatpush1.bf16.msra.mxu1 %v4308_v32 }
 0x19c   :  { %1712 = vmatprep.subr.bf16.mxu1 %v4316_v34 }
 0x19d   :  { %1826 = vmatpush1.bf16.msra.mxu0 %v4317_v38 }
 0x19e   :  { %1827 = vmatprep.subr.bf16.mxu0 %v4325_v41 }
 0x19f   :  { %1713 = vmatpush1.bf16.msra.mxu1 %v4314_v37 }
 0x1a0   :  { %1230 = vmatmul.mubr.bf16.gmra.mxu0 %v4267_v59  ;;  %1714 = vmatprep.subr.bf16.mxu1 %v4322_v40 }
 0x1a1   :  { %1237 = vmatprep.mubr.bf16.mxu0 %v4270_v60  ;;  %1828 = vmatpush1.bf16.msra.mxu0 %v4323_v44 }
 0x1a2   :  { %4074 = vmatmul.mubr.bf16.gmra.mxu1 %v4277_v62  ;;  %1829 = vmatprep.subr.bf16.mxu0 %v4331_v46  ;;  %v4762_v62 = vld [vmem:[%s5157_s3] ss:$0 sm:$0xff] }
 0x1a3   :  { %1734 = vmatprep.mubr.bf16.mxu1 %v4639_v0  ;;  %1715 = vmatpush1.bf16.msra.mxu1 %v4320_v42 }
 0x1a4   :  { %1716 = vmatprep.subr.bf16.mxu1 %v4328_v45 }
 0x1a5   :  { %1830 = vmatpush1.bf16.msra.mxu0 %v4329_v50 }
 0x1a7   :  { %1717 = vmatpush1.bf16.msra.mxu1 %v4326_v49 }
 0x1a8   :  { %1238 = vmatmul.mubr.bf16.gmra.mxu0 %v4272_v63 }
 0x1a9   :  { %1245 = vmatprep.mubr.bf16.mxu0 %v4273_v1 }
 0x1b0   :  { %1246 = vmatmul.mubr.bf16.gmra.mxu0 %v4275_v4 }
 0x1b1   :  { %1253 = vmatprep.mubr.bf16.mxu0 %v4278_v5 }
 0x1b8   :  { %1254 = vmatmul.mubr.bf16.gmra.mxu0 %v4280_v7 }
 0x1b9   :  { %1261 = vmatprep.mubr.bf16.mxu0 %v4281_v8 }
 0x1c0   :  { %1262 = vmatmul.mubr.bf16.gmra.mxu0 %v4283_v9 }
 0x1c1   :  { %1847 = vmatprep.mubr.bf16.mxu0 %v4639_v0 }
 0x248   :  { %v3885_v51 = vpop.f32.mrf.mxu0 }
 0x24a   :  { %v4063_v53 = vpop.f32.mrf.mxu1  ;;  %v3886_v55 = vpop.f32.mrf.mxu0 }
 0x24b   :  { %v3887_v56 = vadd.f32 %v3886_v55, %v3885_v51 }
 0x24c   :  { %v1304_v57 = vpop.f32.mrf.mxu1  ;;  %v3888_v59 = vpop.f32.mrf.mxu0 }
 0x24d   :  { %v1305_v60 = vadd.f32 %v3887_v56, %v1304_v57 }
 0x24e   :  { %v4064_v63 = vpop.f32.mrf.mxu1  ;;  %v3889_v1 = vpop.f32.mrf.mxu0 }
 0x24f   :  { %v1367_v4 = vadd.f32 %v1305_v60, %v4725_v43  ;;  %v3890_v5 = vadd.f32 %v3889_v1, %v3888_v59 }
 0x250   :  { %v1307_v7 = vpop.f32.mrf.mxu1  ;;  %v3891_v8 = vpop.f32.mrf.mxu0 }
 0x251   :  { %v4766_v9 = vadd.f32 %v4762_v62, %v1367_v4  ;;  %v1308_v10 = vadd.f32 %v3890_v5, %v1307_v7 }
 0x252   :  { %v3892_v11 = vpop.f32.mrf.mxu0  ;;  %v4067_v18 = vpop.f32.mrf.mxu1 }
 0x253   :  { %v1422_v12 = vmin.f32 %v4766_v9, 0.0  ;;  %v1368_v14 = vadd.f32 %v1308_v10, %v4727_v47  ;;  %v3893_v15 = vadd.f32 %v3892_v11, %v3891_v8  ;;  %vm1406_vm0 = vcmp.gt.f32.partialorder %v4766_v9, 0.0 }
 0x254   :  { %v3894_v16 = vpop.f32.mrf.mxu0  ;;  %v1320_v26 = vpop.f32.mrf.mxu1 }
 0x255   :  { %v1438_v19 = vmul.f32 1.442695, %v1422_v12  ;;  %v1391_v20 = vadd.f32 %v4762_v62, %v1368_v14  ;;  %v1313_v21 = vadd.f32 %v4063_v53, %v3893_v15 }
 0x256   :  { %v3895_v43 = vpop.f32.mrf.mxu0  ;;  %v4068_v36 = vpop.f32.mrf.mxu1 }
 0x257   :  { %4396 = vpow2.f32 %v1438_v19  ;;  %v1423_v22 = vmin.f32 %v1391_v20, 0.0  ;;  %v1369_v23 = vadd.f32 %v1313_v21, %v4729_v54  ;;  %v3896_v25 = vadd.f32 %v3895_v43, %v3894_v16 }
 0x258   :  { %v3897_v27 = vpop.f32.mrf.mxu0  ;;  %v1323_v46 = vpop.f32.mrf.mxu1  ;;  %vm1407_vm1 = vcmp.gt.f32.partialorder %v1391_v20, 0.0 }
 0x259   :  { %v1440_v29 = vmul.f32 1.442695, %v1423_v22  ;;  %v4773_v30 = vadd.f32 %v4762_v62, %v1369_v23  ;;  %v1316_v47 = vadd.f32 %v4064_v63, %v3896_v25 }
 0x25a   :  { %v3898_v31 = vpop.f32.mrf.mxu0  ;;  %v4787_v60 = vpop.f32.mrf.mxu1 }
 0x25b   :  { %4398 = vpow2.f32 %v1440_v29  ;;  %v1424_v32 = vmin.f32 %v4773_v30, 0.0  ;;  %v3899_v33 = vadd.f32 %v3898_v31, %v3897_v27  ;;  %v1370_v34 = vadd.f32 %v1316_v47, %v4731_v58 }
 0x25c   :  { %v3900_v37 = vpop.f32.mrf.mxu0  ;;  %v1336_v12 = vpop.f32.mrf.mxu1  ;;  %vm1408_vm2 = vcmp.gt.f32.partialorder %v4773_v30, 0.0 }
 0x25d   :  { %v1442_v38 = vmul.f32 1.442695, %v1424_v32  ;;  %v1321_v40 = vadd.f32 %v3899_v33, %v1320_v26  ;;  %v4778_v54 = vadd.f32 %v4762_v62, %v1370_v34 }
 0x25e   :  { %v3901_v41 = vpop.f32.mrf.mxu0  ;;  %v4072_v27 = vpop.f32.mrf.mxu1 }
 0x25f   :  { %v1371_v42 = vadd.f32 %v1321_v40, %v4733_v2  ;;  %v3902_v44 = vadd.f32 %v3901_v41, %v3900_v37  ;;  %4400 = vpow2.f32 %v1442_v38  ;;  %v1425_v45 = vmin.f32 %v4778_v54, 0.0 }
 0x260   :  { %v3903_v49 = vpop.f32.mrf.mxu0  ;;  %vm1409_vm3 = vcmp.gt.f32.partialorder %v4778_v54, 0.0 }
 0x261   :  { %v4783_v50 = vadd.f32 %v4762_v62, %v1371_v42  ;;  %v1324_v58 = vadd.f32 %v3902_v44, %v1323_v46  ;;  %v1444_v51 = vmul.f32 1.442695, %v1425_v45 }
 0x262   :  { %v3904_v53 = vpop.f32.mrf.mxu0 }
 0x263   :  { %v1426_v55 = vmin.f32 %v4783_v50, 0.0  ;;  %v1372_v56 = vadd.f32 %v1324_v58, %v4735_v6  ;;  %v3905_v57 = vadd.f32 %v3904_v53, %v3903_v49  ;;  %4402 = vpow2.f32 %v1444_v51 }
 0x264   :  { %v4397_v59 = vpop.eup %4396  ;;  %v3906_v2 = vpop.f32.mrf.mxu0  ;;  %vm1410_vm4 = vcmp.gt.f32.partialorder %v4783_v50, 0.0 }
 0x265   :  { %v1446_v63 = vmul.f32 1.442695, %v1426_v55  ;;  %v4790_v1 = vadd.f32 %v4762_v62, %v1372_v56  ;;  %v1329_v4 = vadd.f32 %v4067_v18, %v3905_v57  ;;  %v3301_v5 = vadd.f32 -1.0, %v4397_v59 }
 0x266   :  { %v3907_v7 = vpop.f32.mrf.mxu0 }
 0x267   :  { %v1427_v8 = vmin.f32 %v4790_v1, 0.0  ;;  %v1373_v10 = vadd.f32 %v1329_v4, %v4737_v13  ;;  %4404 = vpow2.f32 %v1446_v63  ;;  %v3908_v6 = vadd.f32 %v3907_v7, %v3906_v2 }
 0x268   :  { %v4399_v11 = vpop.eup %4398  ;;  %v3909_v14 = vpop.f32.mrf.mxu0  ;;  %v1486_v18 = vsel %vm1406_vm0, %v4766_v9, %v3301_v5  ;;  %vm1411_vm5 = vcmp.gt.f32.partialorder %v4790_v1, 0.0 }
 0x269   :  { %v3302_v15 = vadd.f32 -1.0, %v4399_v11  ;;  %v1448_v16 = vmul.f32 1.442695, %v1427_v8  ;;  %v4796_v19 = vadd.f32 %v4762_v62, %v1373_v10  ;;  %v1332_v21 = vadd.f32 %v4068_v36, %v3908_v6  ;;  %v1339_v36 = vpop.f32.mrf.mxu1 }
 0x26a   :  { %v3910_v43 = vpop.f32.mrf.mxu0 }
 0x26b   :  { %v1487_v22 = vsel %vm1407_vm1, %v1391_v20, %v3302_v15  ;;  %4406 = vpow2.f32 %v1448_v16  ;;  %v1428_v13 = vmin.f32 %v4796_v19, 0.0  ;;  %v3911_v23 = vadd.f32 %v3910_v43, %v3909_v14  ;;  %v4815_v53 = vpop.f32.mrf.mxu1 }
 0x26c   :  { %v1502_v25 = vpack.c.bf16 %v1487_v22, %v1486_v18  ;;  %v1374_v26 = vadd.f32 %v1332_v21, %v4739_v17  ;;  %v3912_v29 = vpop.f32.mrf.mxu0  ;;  %v4401_v47 = vpop.eup %4400  ;;  %vm1412_vm6 = vcmp.gt.f32.partialorder %v4796_v19, 0.0 }
 0x26d   :  { %v1450_v31 = vmul.f32 1.442695, %v1428_v13  ;;  %v1337_v32 = vadd.f32 %v3911_v23, %v1336_v12  ;;  %v3303_v38 = vadd.f32 -1.0, %v4401_v47  ;;  %v1352_v10 = vpop.f32.mrf.mxu1 }
 0x26e   :  { %v4802_v33 = vadd.f32 %v4762_v62, %v1374_v26  ;;  %v3913_v9 = vpop.f32.mrf.mxu0  ;;  %1735 = vmatmul.mubr.bf16.vlgmr.msra.gmra.mxu1 %v1502_v25  ;;  %1848 = vmatmul.mubr.bf16.vlgmr.msra.gmra.mxu0 %v1502_v25 }
 0x26f   :  { %v1375_v20 = vadd.f32 %v1337_v32, %v4741_v24  ;;  %v3914_v34 = vadd.f32 %v3913_v9, %v3912_v29  ;;  %1744 = vmatprep.mubr.bf16.mxu1 %v4639_v0  ;;  %1857 = vmatprep.mubr.bf16.mxu0 %v4639_v0  ;;  %4408 = vpow2.f32 %v1450_v31  ;;  %v1488_v55 = vsel %vm1408_vm2, %v4773_v30, %v3303_v38  ;;  %v4076_v21 = vpop.f32.mrf.mxu1 }
 0x270   :  { %v1429_v17 = vmin.f32 %v4802_v33, 0.0  ;;  %v3915_v37 = vpop.f32.mrf.mxu0  ;;  %v4403_v40 = vpop.eup %4402  ;;  %vm1413_vm7 = vcmp.gt.f32.partialorder %v4802_v33, 0.0 }
 0x271   :  { %v4809_v41 = vadd.f32 %v4762_v62, %v1375_v20  ;;  %v1340_v42 = vadd.f32 %v3914_v34, %v1339_v36  ;;  %v3304_v24 = vadd.f32 -1.0, %v4403_v40  ;;  %v1355_v9 = vpop.f32.mrf.mxu1 }
 0x272   :  { %v1452_v44 = vmul.f32 1.442695, %v1429_v17  ;;  %v3916_v45 = vpop.f32.mrf.mxu0 }
 0x273   :  { %v1430_v46 = vmin.f32 %v4809_v41, 0.0  ;;  %v1376_v49 = vadd.f32 %v1340_v42, %v4743_v28  ;;  %v3917_v58 = vadd.f32 %v3916_v45, %v3915_v37  ;;  %v1489_v56 = vsel %vm1409_vm3, %v4778_v54, %v3304_v24 }
 0x274   :  { %4410 = vpow2.f32 %v1452_v44  ;;  %v3918_v51 = vpop.f32.mrf.mxu0  ;;  %v4405_v57 = vpop.eup %4404  ;;  %v1503_v4 = vpack.c.bf16 %v1489_v56, %v1488_v55  ;;  %vm1414_vm8 = vcmp.gt.f32.partialorder %v4809_v41, 0.0 }
 0x275   :  { %v1454_v59 = vmul.f32 1.442695, %v1430_v46  ;;  %v4820_v2 = vadd.f32 %v4762_v62, %v1376_v49  ;;  %v1345_v63 = vadd.f32 %v4787_v60, %v3917_v58  ;;  %v3305_v11 = vadd.f32 -1.0, %v4405_v57 }
 0x276   :  { %v3919_v28 = vpop.f32.mrf.mxu0  ;;  %1745 = vmatmul.mubr.bf16.gmra.mxu1 %v1503_v4  ;;  %1858 = vmatmul.mubr.bf16.gmra.mxu0 %v1503_v4 }
 0x277   :  { %4412 = vpow2.f32 %v1454_v59  ;;  %v1431_v5 = vmin.f32 %v4820_v2, 0.0  ;;  %v1377_v7 = vadd.f32 %v1345_v63, %v4745_v35  ;;  %v3920_v8 = vadd.f32 %v3919_v28, %v3918_v51  ;;  %1754 = vmatprep.mubr.bf16.mxu1 %v4639_v0  ;;  %1867 = vmatprep.mubr.bf16.mxu0 %v4639_v0 }
 0x278   :  { %v4407_v30 = vpop.eup %4406  ;;  %v3921_v54 = vpop.f32.mrf.mxu0  ;;  %v1490_v22 = vsel %vm1410_vm4, %v4783_v50, %v3305_v11  ;;  %vm1415_vm9 = vcmp.gt.f32.partialorder %v4820_v2, 0.0 }
 0x279   :  { %v1456_v6 = vmul.f32 1.442695, %v1431_v5  ;;  %v4828_v60 = vadd.f32 %v4762_v62, %v1377_v7  ;;  %v1348_v12 = vadd.f32 %v4072_v27, %v3920_v8  ;;  %v3306_v14 = vadd.f32 -1.0, %v4407_v30 }
 0x27a   :  { %v3922_v15 = vpop.f32.mrf.mxu0 }
 0x27b   :  { %4414 = vpow2.f32 %v1456_v6  ;;  %v1432_v35 = vmin.f32 %v4828_v60, 0.0  ;;  %v1378_v16 = vadd.f32 %v1348_v12, %v4747_v39  ;;  %v3923_v18 = vadd.f32 %v3922_v15, %v3921_v54 }
 0x27c   :  { %v3924_v43 = vpop.f32.mrf.mxu0  ;;  %v1491_v13 = vsel %vm1411_vm5, %v4790_v1, %v3306_v14  ;;  %v4409_v23 = vpop.eup %4408  ;;  %vm1416_vm10 = vcmp.gt.f32.partialorder %v4828_v60, 0.0 }
 0x27d   :  { %v1458_v25 = vmul.f32 1.442695, %v1432_v35  ;;  %v4837_v26 = vadd.f32 %v4762_v62, %v1378_v16  ;;  %v1353_v27 = vadd.f32 %v3923_v18, %v1352_v10  ;;  %v1504_v29 = vpack.c.bf16 %v1491_v13, %v1490_v22 }
 0x27e   :  { %v3925_v47 = vpop.f32.mrf.mxu0  ;;  %v3307_v1 = vadd.f32 -1.0, %v4409_v23 }
 0x27f   :  { %4416 = vpow2.f32 %v1458_v25  ;;  %v1433_v31 = vmin.f32 %v4837_v26, 0.0  ;;  %v1379_v39 = vadd.f32 %v1353_v27, %v4749_v48  ;;  %v3926_v32 = vadd.f32 %v3925_v47, %v3924_v43  ;;  %1755 = vmatmul.mubr.bf16.gmra.mxu1 %v1504_v29  ;;  %1868 = vmatmul.mubr.bf16.gmra.mxu0 %v1504_v29 }
 0x280   :  { %v3927_v50 = vpop.f32.mrf.mxu0  ;;  %1764 = vmatprep.mubr.bf16.mxu1 %v4639_v0  ;;  %1877 = vmatprep.mubr.bf16.mxu0 %v4639_v0  ;;  %v1492_v24 = vsel %vm1412_vm6, %v4796_v19, %v3307_v1  ;;  %vm1417_vm11 = vcmp.gt.f32.partialorder %v4837_v26, 0.0 }
 0x281   :  { %v4411_v20 = vpop.eup %4410  ;;  %v1460_v34 = vmul.f32 1.442695, %v1433_v31  ;;  %v4844_v17 = vadd.f32 %v4762_v62, %v1379_v39  ;;  %v1356_v36 = vadd.f32 %v3926_v32, %v1355_v9  ;;  %v4358_v31 = vld [vmem:[#allocation3 + $0x4] ss:$12 sps:$4 sm:$0xff]   ;;  %v4359_v39 = vld [vmem:[#allocation3 + $0x8] ss:$12 sps:$4 sm:$0xff]  }
 0x282   :  { %v3928_v37 = vpop.f32.mrf.mxu0  ;;  %v3308_v48 = vadd.f32 -1.0, %v4411_v20 }
 0x283   :  { %4418 = vpow2.f32 %v1460_v34  ;;  %v1434_v38 = vmin.f32 %v4844_v17, 0.0  ;;  %v1380_v40 = vadd.f32 %v1356_v36, %v4751_v52  ;;  %v3929_v42 = vadd.f32 %v3928_v37, %v3927_v50 }
 0x284   :  { %v4413_v44 = vpop.eup %4412  ;;  %v3930_v45 = vpop.f32.mrf.mxu0  ;;  %v1493_v46 = vsel %vm1413_vm7, %v4802_v33, %v3308_v48  ;;  %vm1418_vm12 = vcmp.gt.f32.partialorder %v4844_v17, 0.0 }
 0x285   :  { %v1462_v49 = vmul.f32 1.442695, %v1434_v38  ;;  %v1403_v58 = vadd.f32 %v4762_v62, %v1380_v40  ;;  %v1361_v51 = vadd.f32 %v4815_v53, %v3929_v42  ;;  %v1505_v55 = vpack.c.bf16 %v1493_v46, %v1492_v24 }
 0x286   :  { %v3931_v56 = vpop.f32.mrf.mxu0  ;;  %v3309_v57 = vadd.f32 -1.0, %v4413_v44 }
 0x287   :  { %4420 = vpow2.f32 %v1462_v49  ;;  %v1435_v59 = vmin.f32 %v1403_v58, 0.0  ;;  %v1381_v63 = vadd.f32 %v1361_v51, %v4753_v61  ;;  %v3932_v52 = vadd.f32 %v3931_v56, %v3930_v45  ;;  %1765 = vmatmul.mubr.bf16.gmra.mxu1 %v1505_v55  ;;  %1878 = vmatmul.mubr.bf16.gmra.mxu0 %v1505_v55 }
 0x288   :  { %v4415_v4 = vpop.eup %4414  ;;  %1774 = vmatprep.mubr.bf16.mxu1 %v4639_v0  ;;  %1887 = vmatprep.mubr.bf16.mxu0 %v4639_v0  ;;  %v1494_v5 = vsel %vm1414_vm8, %v4809_v41, %v3309_v57  ;;  %vm1419_vm13 = vcmp.gt.f32.partialorder %v1403_v58, 0.0 }
 0x289   :  { %v1464_v19 = vmul.f32 1.442695, %v1435_v59  ;;  %v1404_v33 = vadd.f32 %v4762_v62, %v1381_v63  ;;  %v1364_v53 = vadd.f32 %v4076_v21, %v3932_v52  ;;  %v3310_v28 = vadd.f32 -1.0, %v4415_v4 }
 0x28b   :  { %4422 = vpow2.f32 %v1464_v19  ;;  %v1436_v61 = vmin.f32 %v1404_v33, 0.0  ;;  %v1382_v7 = vadd.f32 %v1364_v53, %v4755_v3  ;;  %v1495_v8 = vsel %vm1415_vm9, %v4820_v2, %v3310_v28 }
 0x28c   :  { %v4417_v30 = vpop.eup %4416  ;;  %v1506_v10 = vpack.c.bf16 %v1495_v8, %v1494_v5  ;;  %vm1420_vm14 = vcmp.gt.f32.partialorder %v1404_v33, 0.0 }
 0x28d   :  { %v1466_v54 = vmul.f32 1.442695, %v1436_v61  ;;  %v1405_v11 = vadd.f32 %v4762_v62, %v1382_v7  ;;  %v3311_v12 = vadd.f32 -1.0, %v4417_v30 }
 0x28f   :  { %4424 = vpow2.f32 %v1466_v54  ;;  %v1437_v6 = vmin.f32 %v1405_v11, 0.0  ;;  %1775 = vmatmul.mubr.bf16.gmra.mxu1 %v1506_v10  ;;  %1888 = vmatmul.mubr.bf16.gmra.mxu0 %v1506_v10  ;;  %v1496_v3 = vsel %vm1416_vm10, %v4828_v60, %v3311_v12  ;;  %vm1421_vm15 = vcmp.gt.f32.partialorder %v1405_v11, 0.0 }
 0x290   :  { %v4419_v14 = vpop.eup %4418  ;;  %1784 = vmatprep.mubr.bf16.mxu1 %v4639_v0  ;;  %1897 = vmatprep.mubr.bf16.mxu0 %v4639_v0 }
 0x291   :  { %v1468_v41 = vmul.f32 1.442695, %v1437_v6  ;;  %v3312_v15 = vadd.f32 -1.0, %v4419_v14 }
 0x293   :  { %4426 = vpow2.f32 %v1468_v41  ;;  %v1497_v62 = vsel %vm1417_vm11, %v4837_v26, %v3312_v15 }
 0x294   :  { %v4421_v2 = vpop.eup %4420  ;;  %v1507_v35 = vpack.c.bf16 %v1497_v62, %v1496_v3 }
 0x295   :  { %v3313_v16 = vadd.f32 -1.0, %v4421_v2 }
 0x297   :  { %1785 = vmatmul.mubr.bf16.gmra.mxu1 %v1507_v35  ;;  %1898 = vmatmul.mubr.bf16.gmra.mxu0 %v1507_v35  ;;  %v1498_v43 = vsel %vm1418_vm12, %v4844_v17, %v3313_v16 }
 0x298   :  { %v4423_v18 = vpop.eup %4422  ;;  %1794 = vmatprep.mubr.bf16.mxu1 %v4639_v0  ;;  %1907 = vmatprep.mubr.bf16.mxu0 %v4639_v0 }
 0x299   :  { %v3314_v21 = vadd.f32 -1.0, %v4423_v18 }
 0x29b   :  { %v1499_v22 = vsel %vm1419_vm13, %v1403_v58, %v3314_v21 }
 0x29c   :  { %v4425_v60 = vpop.eup %4424  ;;  %v1508_v13 = vpack.c.bf16 %v1499_v22, %v1498_v43 }
 0x29d   :  { %v3315_v23 = vadd.f32 -1.0, %v4425_v60 }
 0x29f   :  { %1795 = vmatmul.mubr.bf16.gmra.mxu1 %v1508_v13  ;;  %1908 = vmatmul.mubr.bf16.gmra.mxu0 %v1508_v13  ;;  %v1500_v27 = vsel %vm1420_vm14, %v1404_v33, %v3315_v23 }
 0x2a0   :  { %v4427_v25 = vpop.eup %4426  ;;  %1804 = vmatprep.mubr.bf16.mxu1 %v4639_v0  ;;  %1917 = vmatprep.mubr.bf16.mxu0 %v4639_v0 }
 0x2a1   :  { %v3316_v26 = vadd.f32 -1.0, %v4427_v25 }
 0x2a3   :  { %v1501_v29 = vsel %vm1421_vm15, %v1405_v11, %v3316_v26 }
 0x2a4   :  { %v1509_v47 = vpack.c.bf16 %v1501_v29, %v1500_v27 }
 0x2a7   :  { %1805 = vmatmul.mubr.bf16.gmra.mxu1 %v1509_v47  ;;  %1918 = vmatmul.mubr.bf16.gmra.mxu0 %v1509_v47 }
 0x2a8   :  { %2552 = vmatprep.mubr.bf16.mxu1 %v4358_v31  ;;  %4093 = vmatprep.mubr.bf16.mxu0 %v4359_v39 }
 0x32e   :  { %v4876_v32 = vpop.f32.mrf.mxu1  ;;  %v1849_v9 = vpop.f32.mrf.mxu0 }
 0x330   :  { %v1738_v50 = vpop.f32.mrf.mxu1  ;;  %v1851_v1 = vpop.f32.mrf.mxu0 }
 0x332   :  { %v4878_v20 = vpop.f32.mrf.mxu1  ;;  %v1853_v0 = vpop.f32.mrf.mxu0 }
 0x333   :  { %v3746_v34 = vpack.c.bf16 %v1853_v0, %v1849_v9 }
 0x334   :  { %v1742_v17 = vpop.f32.mrf.mxu1  ;;  %v1855_v36 = vpop.f32.mrf.mxu0 }
 0x335   :  { %3853 = vst [vmem:[#allocation2 + $0x40] sm:$0xff] %v3746_v34   ;;  %v3706_v37 = vpack.c.bf16 %v1742_v17, %v1738_v50  ;;  %v3786_v48 = vpack.c.bf16 %v1855_v36, %v1851_v1 }
 0x336   :  { %v4880_v38 = vpop.f32.mrf.mxu1  ;;  %v1859_v40 = vpop.f32.mrf.mxu0 }
 0x337   :  { %3707 = vst [vmem:[#allocation2] sm:$0xff] %v3706_v37   ;;  %3861 = vst [vmem:[#allocation2 + $0x80] sm:$0xff] %v3786_v48  }
 0x338   :  { %v1748_v42 = vpop.f32.mrf.mxu1  ;;  %v1861_v44 = vpop.f32.mrf.mxu0 }
 0x33a   :  { %v4882_v45 = vpop.f32.mrf.mxu1  ;;  %v1863_v24 = vpop.f32.mrf.mxu0 }
 0x33b   :  { %v3751_v46 = vpack.c.bf16 %v1863_v24, %v1859_v40 }
 0x33c   :  { %v1752_v49 = vpop.f32.mrf.mxu1  ;;  %v1865_v58 = vpop.f32.mrf.mxu0 }
 0x33d   :  { %3854 = vst [vmem:[#allocation2 + $0x48] sm:$0xff] %v3751_v46   ;;  %v3711_v51 = vpack.c.bf16 %v1752_v49, %v1748_v42  ;;  %v3791_v55 = vpack.c.bf16 %v1865_v58, %v1861_v44 }
 0x33f   :  { %v4884_v56 = vpop.f32.mrf.mxu1  ;;  %v1869_v57 = vpop.f32.mrf.mxu0  ;;  %3846 = vst [vmem:[#allocation2 + $0x8] sm:$0xff] %v3711_v51   ;;  %3862 = vst [vmem:[#allocation2 + $0x88] sm:$0xff] %v3791_v55  }
 0x341   :  { %v1758_v59 = vpop.f32.mrf.mxu1  ;;  %v1871_v63 = vpop.f32.mrf.mxu0 }
 0x343   :  { %v4886_v52 = vpop.f32.mrf.mxu1  ;;  %v1873_v4 = vpop.f32.mrf.mxu0 }
 0x344   :  { %v3756_v19 = vpack.c.bf16 %v1873_v4, %v1869_v57 }
 0x345   :  { %v1762_v33 = vpop.f32.mrf.mxu1  ;;  %v1875_v53 = vpop.f32.mrf.mxu0 }
 0x346   :  { %3855 = vst [vmem:[#allocation2 + $0x50] sm:$0xff] %v3756_v19   ;;  %v3716_v28 = vpack.c.bf16 %v1762_v33, %v1758_v59  ;;  %v3796_v5 = vpack.c.bf16 %v1875_v53, %v1871_v63 }
 0x347   :  { %v4888_v61 = vpop.f32.mrf.mxu1  ;;  %v1879_v7 = vpop.f32.mrf.mxu0 }
 0x348   :  { %3847 = vst [vmem:[#allocation2 + $0x10] sm:$0xff] %v3716_v28   ;;  %3863 = vst [vmem:[#allocation2 + $0x90] sm:$0xff] %v3796_v5  }
 0x349   :  { %v1768_v8 = vpop.f32.mrf.mxu1  ;;  %v1881_v30 = vpop.f32.mrf.mxu0 }
 0x34b   :  { %v4890_v10 = vpop.f32.mrf.mxu1  ;;  %v1883_v54 = vpop.f32.mrf.mxu0 }
 0x34c   :  { %v3761_v11 = vpack.c.bf16 %v1883_v54, %v1879_v7 }
 0x34d   :  { %v1772_v6 = vpop.f32.mrf.mxu1  ;;  %v1885_v12 = vpop.f32.mrf.mxu0 }
 0x34e   :  { %3856 = vst [vmem:[#allocation2 + $0x58] sm:$0xff] %v3761_v11   ;;  %v3721_v14 = vpack.c.bf16 %v1772_v6, %v1768_v8  ;;  %v3801_v41 = vpack.c.bf16 %v1885_v12, %v1881_v30 }
 0x34f   :  { %v4892_v15 = vpop.f32.mrf.mxu1  ;;  %v1889_v3 = vpop.f32.mrf.mxu0 }
 0x350   :  { %3848 = vst [vmem:[#allocation2 + $0x18] sm:$0xff] %v3721_v14   ;;  %3864 = vst [vmem:[#allocation2 + $0x98] sm:$0xff] %v3801_v41  }
 0x351   :  { %v1778_v62 = vpop.f32.mrf.mxu1  ;;  %v1891_v2 = vpop.f32.mrf.mxu0 }
 0x353   :  { %v4894_v35 = vpop.f32.mrf.mxu1  ;;  %v1893_v16 = vpop.f32.mrf.mxu0 }
 0x354   :  { %v3766_v18 = vpack.c.bf16 %v1893_v16, %v1889_v3  ;;  %v4347_v16 = vld [vmem:[#allocation2 + $0x50] sm:$0xff]  }
 0x355   :  { %v1782_v21 = vpop.f32.mrf.mxu1  ;;  %v1895_v43 = vpop.f32.mrf.mxu0  ;;  %v4344_v3 = vld [vmem:[#allocation2 + $0x58] sm:$0xff]  }
 0x356   :  { %3857 = vst [vmem:[#allocation2 + $0x60] sm:$0xff] %v3766_v18   ;;  %v3726_v22 = vpack.c.bf16 %v1782_v21, %v1778_v62  ;;  %v3806_v60 = vpack.c.bf16 %v1895_v43, %v1891_v2  ;;  %v4348_v18 = vld [vmem:[#allocation2 + $0x90] sm:$0xff]   ;;  %v4350_v43 = vld [vmem:[#allocation2 + $0x48] sm:$0xff]  }
 0x357   :  { %v4896_v13 = vpop.f32.mrf.mxu1  ;;  %v1899_v23 = vpop.f32.mrf.mxu0  ;;  %v4345_v62 = vld [vmem:[#allocation2 + $0x98] sm:$0xff]   ;;  %v4349_v21 = vld [vmem:[#allocation2 + $0x10] sm:$0xff]  }
 0x358   :  { %3849 = vst [vmem:[#allocation2 + $0x20] sm:$0xff] %v3726_v22   ;;  %3865 = vst [vmem:[#allocation2 + $0xa0] sm:$0xff] %v3806_v60   ;;  %v4346_v2 = vld [vmem:[#allocation2 + $0x18] sm:$0xff]   ;;  %v4351_v22 = vld [vmem:[#allocation2 + $0x88] sm:$0xff]  }
 0x359   :  { %v1788_v25 = vpop.f32.mrf.mxu1  ;;  %v1901_v26 = vpop.f32.mrf.mxu0  ;;  %v4352_v60 = vld [vmem:[#allocation2 + $0x8] sm:$0xff]  }
 0x35b   :  { %v4898_v27 = vpop.f32.mrf.mxu1  ;;  %v1903_v29 = vpop.f32.mrf.mxu0 }
 0x35c   :  { %v3771_v47 = vpack.c.bf16 %v1903_v29, %v1899_v23  ;;  %v4353_v23 = vld [vmem:[#allocation2 + $0x40] sm:$0xff]  }
 0x35d   :  { %v1792_v31 = vpop.f32.mrf.mxu1  ;;  %v1905_v39 = vpop.f32.mrf.mxu0  ;;  %v4341_v12 = vld [vmem:[#allocation2 + $0x60] sm:$0xff]  }
 0x35e   :  { %3858 = vst [vmem:[#allocation2 + $0x68] sm:$0xff] %v3771_v47   ;;  %v3731_v9 = vpack.c.bf16 %v1792_v31, %v1788_v25  ;;  %v3811_v50 = vpack.c.bf16 %v1905_v39, %v1901_v26  ;;  %v4354_v25 = vld [vmem:[#allocation2 + $0x80] sm:$0xff]   ;;  %v4361_v47 = vld [vmem:[#allocation11 + $0x38] sm:$0xff]  }
 0x35f   :  { %v4900_v1 = vpop.f32.mrf.mxu1  ;;  %v1909_v0 = vpop.f32.mrf.mxu0  ;;  %v4342_v14 = vld [vmem:[#allocation2 + $0xa0] sm:$0xff]   ;;  %v4363_v31 = vld [vmem:[#allocation3 + $0x1c] ss:$12 sps:$4 sm:$0xff]  }
 0x360   :  { %3850 = vst [vmem:[#allocation2 + $0x28] sm:$0xff] %v3731_v9   ;;  %3866 = vst [vmem:[#allocation2 + $0xa8] sm:$0xff] %v3811_v50   ;;  %v4343_v41 = vld [vmem:[#allocation2 + $0x20] sm:$0xff]   ;;  %v4362_v50 = vld [vmem:[#allocation11 + $0x30] sm:$0xff]  }
 0x361   :  { %v1798_v34 = vpop.f32.mrf.mxu1  ;;  %v1911_v17 = vpop.f32.mrf.mxu0  ;;  %v4355_v26 = vld [vmem:[#allocation2] sm:$0xff]  }
 0x362   :  { %v4356_v29 = vld [vmem:[#allocation3] ss:$12 sps:$4 sm:$0xff]   ;;  %v4366_v9 = vld [vmem:[#allocation3 + $0x38] ss:$12 sps:$4 sm:$0xff]  }
 0x363   :  { %v4902_v36 = vpop.f32.mrf.mxu1  ;;  %v1913_v37 = vpop.f32.mrf.mxu0  ;;  %v4360_v39 = vld [vmem:[#allocation3 + $0x20] ss:$12 sps:$4 sm:$0xff]  }
 0x364   :  { %v3776_v48 = vpack.c.bf16 %v1913_v37, %v1909_v0  ;;  %v4365_v0 = vld [vmem:[#allocation3 + $0x18] ss:$12 sps:$4 sm:$0xff]   ;;  %v4367_v37 = vld [vmem:[#allocation3 + $0x50] ss:$12 sps:$4 sm:$0xff]  }
 0x365   :  { %v1802_v40 = vpop.f32.mrf.mxu1  ;;  %v1915_v42 = vpop.f32.mrf.mxu0  ;;  %v4338_v54 = vld [vmem:[#allocation2 + $0x68] sm:$0xff]  }
 0x366   :  { %3859 = vst [vmem:[#allocation2 + $0x70] sm:$0xff] %v3776_v48   ;;  %v3736_v44 = vpack.c.bf16 %v1802_v40, %v1798_v34  ;;  %v3816_v24 = vpack.c.bf16 %v1915_v42, %v1911_v17  ;;  %v4368_v34 = vld [vmem:[#allocation11 + $0x28] sm:$0xff]   ;;  %v4370_v17 = vld [vmem:[#allocation3 + $0x34] ss:$12 sps:$4 sm:$0xff]   ;;  %v4372_v42 = vld [vmem:[#allocation3 + $0x30] ss:$12 sps:$4 sm:$0xff]  }
 0x367   :  { %v4904_v46 = vpop.f32.mrf.mxu1  ;;  %v1919_v49 = vpop.f32.mrf.mxu0  ;;  %v4339_v11 = vld [vmem:[#allocation2 + $0xa8] sm:$0xff]   ;;  %v4369_v40 = vld [vmem:[#allocation11 + $0x20] sm:$0xff]  }
 0x368   :  { %3851 = vst [vmem:[#allocation2 + $0x30] sm:$0xff] %v3736_v44   ;;  %3867 = vst [vmem:[#allocation2 + $0xb0] sm:$0xff] %v3816_v24   ;;  %v4340_v6 = vld [vmem:[#allocation2 + $0x28] sm:$0xff]   ;;  %v4375_v44 = vld [vmem:[#allocation11 + $0x18] sm:$0xff]  }
 0x369   :  { %v1808_v58 = vpop.f32.mrf.mxu1  ;;  %v1921_v51 = vpop.f32.mrf.mxu0  ;;  %v4373_v48 = vld [vmem:[#allocation3 + $0x68] ss:$12 sps:$4 sm:$0xff]   ;;  %v4377_v24 = vld [vmem:[#allocation3 + $0x4c] ss:$12 sps:$4 sm:$0xff]  }
 0x36b   :  { %v4906_v55 = vpop.f32.mrf.mxu1  ;;  %v1923_v57 = vpop.f32.mrf.mxu0 }
 0x36c   :  { %v3781_v59 = vpack.c.bf16 %v1923_v57, %v1919_v49  ;;  %v4374_v49 = vld [vmem:[#allocation3 + $0x80] ss:$12 sps:$4 sm:$0xff]   ;;  %v4379_v57 = vld [vmem:[#allocation3 + $0x48] ss:$12 sps:$4 sm:$0xff]  }
 0x36d   :  { %v1812_v63 = vpop.f32.mrf.mxu1  ;;  %v1925_v4 = vpop.f32.mrf.mxu0  ;;  %v4335_v28 = vld [vmem:[#allocation2 + $0x70] sm:$0xff]  }
 0x36e   :  { %3860 = vst [vmem:[#allocation2 + $0x78] sm:$0xff] %v3781_v59   ;;  %v3741_v19 = vpack.c.bf16 %v1812_v63, %v1808_v58  ;;  %v3821_v33 = vpack.c.bf16 %v1925_v4, %v1921_v51  ;;  %v4380_v58 = vld [vmem:[#allocation3 + $0x98] ss:$12 sps:$4 sm:$0xff]   ;;  %v4376_v51 = vld [vmem:[#allocation11 + $0x10] sm:$0xff]   ;;  %v4382_v59 = vld [vmem:[#allocation11 + $0x8] sm:$0xff]  }
 0x36f   :  { %v4336_v8 = vld [vmem:[#allocation2 + $0xb0] sm:$0xff]  }
 0x370   :  { %3852 = vst [vmem:[#allocation2 + $0x38] sm:$0xff] %v3741_v19   ;;  %3868 = vst [vmem:[#allocation2 + $0xb8] sm:$0xff] %v3821_v33   ;;  %v4337_v30 = vld [vmem:[#allocation2 + $0x30] sm:$0xff]   ;;  %v4383_v19 = vld [vmem:[#allocation11] sm:$0xff]  }
 0x371   :  { %v4384_v63 = vld [vmem:[#allocation3 + $0x64] ss:$12 sps:$4 sm:$0xff]  }
 0x372   :  { %v4381_v4 = vld [vmem:[#allocation3 + $0xb0] ss:$12 sps:$4 sm:$0xff]   ;;  %v4492_v33 = vld [vmem:[#allocation6] sm:$0xff]  }
 0x375   :  { %v4332_v53 = vld [vmem:[#allocation2 + $0x78] sm:$0xff]  }
 0x376   :  { %3949 = vmatprep.subr.bf16.mxu1 %v4332_v53  ;;  %v4386_v53 = vld [vmem:[#allocation3 + $0x60] ss:$12 sps:$4 sm:$0xff]  }
 0x377   :  { %v4333_v5 = vld [vmem:[#allocation2 + $0x38] sm:$0xff]  }
 0x378   :  { %v4334_v7 = vld [vmem:[#allocation2 + $0xb8] sm:$0xff]   ;;  %3950 = vmatpush3.bf16.msra.mxu1 %v4333_v5  ;;  %v4493_v5 = vld [vmem:[#allocation6 + $0x8] sm:$0xff]  }
 0x379   :  { %4077 = vmatprep.subr.bf16.mxu0 %v4334_v7  ;;  %3951 = vmatprep.subr.bf16.mxu1 %v4335_v28  ;;  %v4387_v28 = vld [vmem:[#allocation3 + $0x7c] ss:$12 sps:$4 sm:$0xff]  }
 0x37a   :  { %4078 = vmatpush3.bf16.msra.mxu0 %v4334_v7  ;;  %v4494_v7 = vld [vmem:[#allocation6 + $0x10] sm:$0xff]  }
 0x37b   :  { %4079 = vmatprep.subr.bf16.mxu0 %v4336_v8 }
 0x37c   :  { %3952 = vmatpush3.bf16.msra.mxu1 %v4337_v30  ;;  %v4390_v30 = vld [vmem:[#allocation3 + $0x94] ss:$12 sps:$4 sm:$0xff]  }
 0x37d   :  { %3953 = vmatprep.subr.bf16.mxu1 %v4338_v54  ;;  %v4495_v54 = vld [vmem:[#allocation6 + $0x18] sm:$0xff]  }
 0x37e   :  { %4080 = vmatpush3.bf16.msra.mxu0 %v4336_v8  ;;  %v4389_v8 = vld [vmem:[#allocation3 + $0x78] ss:$12 sps:$4 sm:$0xff]  }
 0x37f   :  { %4081 = vmatprep.subr.bf16.mxu0 %v4339_v11 }
 0x380   :  { %3954 = vmatpush3.bf16.msra.mxu1 %v4340_v6  ;;  %v4393_v6 = vld [vmem:[#allocation3 + $0xac] ss:$12 sps:$4 sm:$0xff]  }
 0x381   :  { %3955 = vmatprep.subr.bf16.mxu1 %v4341_v12  ;;  %v4395_v12 = vld [vmem:[#allocation3 + $0xa8] ss:$12 sps:$4 sm:$0xff]  }
 0x382   :  { %4082 = vmatpush3.bf16.msra.mxu0 %v4339_v11  ;;  %v4392_v11 = vld [vmem:[#allocation3 + $0x90] ss:$12 sps:$4 sm:$0xff]  }
 0x383   :  { %4083 = vmatprep.subr.bf16.mxu0 %v4342_v14 }
 0x384   :  { %3956 = vmatpush3.bf16.msra.mxu1 %v4343_v41  ;;  %v4497_v41 = vld [vmem:[#allocation6 + $0x28] sm:$0xff]  }
 0x385   :  { %3957 = vmatprep.subr.bf16.mxu1 %v4344_v3  ;;  %v4498_v3 = vld [vmem:[#allocation6 + $0x30] sm:$0xff]  }
 0x386   :  { %4084 = vmatpush3.bf16.msra.mxu0 %v4342_v14  ;;  %v4496_v14 = vld [vmem:[#allocation6 + $0x20] sm:$0xff]  }
 0x387   :  { %4085 = vmatprep.subr.bf16.mxu0 %v4345_v62 }
 0x388   :  { %3958 = vmatpush3.bf16.msra.mxu1 %v4346_v2 }
 0x389   :  { %3959 = vmatprep.subr.bf16.mxu1 %v4347_v16 }
 0x38a   :  { %4086 = vmatpush3.bf16.msra.mxu0 %v4345_v62  ;;  %v4499_v62 = vld [vmem:[#allocation6 + $0x38] sm:$0xff]  }
 0x38b   :  { %4087 = vmatprep.subr.bf16.mxu0 %v4348_v18 }
 0x38c   :  { %3960 = vmatpush3.bf16.msra.mxu1 %v4349_v21 }
 0x38d   :  { %3961 = vmatprep.subr.bf16.mxu1 %v4350_v43 }
 0x38e   :  { %4088 = vmatpush3.bf16.msra.mxu0 %v4348_v18 }
 0x38f   :  { %4089 = vmatprep.subr.bf16.mxu0 %v4351_v22 }
 0x390   :  { %3962 = vmatpush3.bf16.msra.mxu1 %v4352_v60 }
 0x391   :  { %3963 = vmatprep.subr.bf16.mxu1 %v4353_v23  ;;  %v4911_v23 = vld [vmem:[%s5159_s5] ss:$0 sm:$0xff] }
 0x392   :  { %4090 = vmatpush3.bf16.msra.mxu0 %v4351_v22 }
 0x393   :  { %4091 = vmatprep.subr.bf16.mxu0 %v4354_v25 }
 0x394   :  { %3964 = vmatpush3.bf16.msra.mxu1 %v4355_v26 }
 0x395   :  { %4141 = vmatprep.subr.bf16.mxu1 %v4361_v47 }
 0x396   :  { %4092 = vmatpush3.bf16.msra.mxu0 %v4354_v25 }
 0x397   :  { %2553 = vmatmul.mubr.bf16.vlgmr.msra.gmra.mxu1 %v4356_v29  ;;  %4109 = vmatprep.subr.bf16.mxu0 %v4361_v47 }
 0x398   :  { %2560 = vmatprep.mubr.bf16.mxu1 %v4363_v31  ;;  %4149 = vmatpush3.bf16.msra.mxu1 %v4361_v47 }
 0x399   :  { %4094 = vmatmul.mubr.bf16.vlgmr.msra.gmra.mxu0 %v4360_v39  ;;  %4142 = vmatprep.subr.bf16.mxu1 %v4362_v50 }
 0x39a   :  { %4110 = vmatpush3.bf16.msra.mxu0 %v4361_v47  ;;  %4097 = vmatprep.mubr.bf16.mxu0 %v4366_v9 }
 0x39b   :  { %4111 = vmatprep.subr.bf16.mxu0 %v4362_v50 }
 0x39c   :  { %4150 = vmatpush3.bf16.msra.mxu1 %v4362_v50 }
 0x39d   :  { %4143 = vmatprep.subr.bf16.mxu1 %v4368_v34 }
 0x39e   :  { %4112 = vmatpush3.bf16.msra.mxu0 %v4362_v50 }
 0x39f   :  { %2561 = vmatmul.mubr.bf16.gmra.mxu1 %v4365_v0  ;;  %4113 = vmatprep.subr.bf16.mxu0 %v4368_v34 }
 0x3a0   :  { %2568 = vmatprep.mubr.bf16.mxu1 %v4370_v17  ;;  %4151 = vmatpush3.bf16.msra.mxu1 %v4368_v34 }
 0x3a1   :  { %4098 = vmatmul.mubr.bf16.gmra.mxu0 %v4367_v37  ;;  %4144 = vmatprep.subr.bf16.mxu1 %v4369_v40 }
 0x3a2   :  { %4114 = vmatpush3.bf16.msra.mxu0 %v4368_v34  ;;  %4101 = vmatprep.mubr.bf16.mxu0 %v4373_v48 }
 0x3a3   :  { %4115 = vmatprep.subr.bf16.mxu0 %v4369_v40 }
 0x3a4   :  { %4152 = vmatpush3.bf16.msra.mxu1 %v4369_v40 }
 0x3a5   :  { %4145 = vmatprep.subr.bf16.mxu1 %v4375_v44 }
 0x3a6   :  { %4116 = vmatpush3.bf16.msra.mxu0 %v4369_v40 }
 0x3a7   :  { %2569 = vmatmul.mubr.bf16.gmra.mxu1 %v4372_v42  ;;  %4117 = vmatprep.subr.bf16.mxu0 %v4375_v44 }
 0x3a8   :  { %2576 = vmatprep.mubr.bf16.mxu1 %v4377_v24  ;;  %4153 = vmatpush3.bf16.msra.mxu1 %v4375_v44 }
 0x3a9   :  { %4102 = vmatmul.mubr.bf16.gmra.mxu0 %v4374_v49  ;;  %4146 = vmatprep.subr.bf16.mxu1 %v4376_v51 }
 0x3aa   :  { %4118 = vmatpush3.bf16.msra.mxu0 %v4375_v44  ;;  %4105 = vmatprep.mubr.bf16.mxu0 %v4380_v58 }
 0x3ab   :  { %4119 = vmatprep.subr.bf16.mxu0 %v4376_v51 }
 0x3ac   :  { %4154 = vmatpush3.bf16.msra.mxu1 %v4376_v51 }
 0x3ad   :  { %4147 = vmatprep.subr.bf16.mxu1 %v4382_v59 }
 0x3ae   :  { %4120 = vmatpush3.bf16.msra.mxu0 %v4376_v51 }
 0x3af   :  { %2577 = vmatmul.mubr.bf16.gmra.mxu1 %v4379_v57  ;;  %4121 = vmatprep.subr.bf16.mxu0 %v4382_v59 }
 0x3b0   :  { %2584 = vmatprep.mubr.bf16.mxu1 %v4384_v63  ;;  %4155 = vmatpush3.bf16.msra.mxu1 %v4382_v59 }
 0x3b1   :  { %4106 = vmatmul.mubr.bf16.gmra.mxu0 %v4381_v4  ;;  %4148 = vmatprep.subr.bf16.mxu1 %v4383_v19 }
 0x3b2   :  { %4122 = vmatpush3.bf16.msra.mxu0 %v4382_v59  ;;  %4125 = vmatprep.mubr.bf16.mxu0 %v4492_v33 }
 0x3b3   :  { %4123 = vmatprep.subr.bf16.mxu0 %v4383_v19 }
 0x3b4   :  { %4156 = vmatpush3.bf16.msra.mxu1 %v4383_v19 }
 0x3b6   :  { %4124 = vmatpush3.bf16.msra.mxu0 %v4383_v19 }
 0x3b7   :  { %2585 = vmatmul.mubr.bf16.gmra.mxu1 %v4386_v53 }
 0x3b8   :  { %2592 = vmatprep.mubr.bf16.mxu1 %v4387_v28 }
 0x3b9   :  { %4126 = vmatmul.mubr.bf16.vlgmr.msra.gmra.mxu0 %v4493_v5 }
 0x3ba   :  { %4129 = vmatprep.mubr.bf16.mxu0 %v4494_v7 }
 0x3bf   :  { %2593 = vmatmul.mubr.bf16.gmra.mxu1 %v4389_v8 }
 0x3c0   :  { %2600 = vmatprep.mubr.bf16.mxu1 %v4390_v30 }
 0x3c1   :  { %4130 = vmatmul.mubr.bf16.gmra.mxu0 %v4495_v54 }
 0x3c7   :  { %2601 = vmatmul.mubr.bf16.gmra.mxu1 %v4392_v11 }
 0x3c8   :  { %2608 = vmatprep.mubr.bf16.mxu1 %v4393_v6 }
 0x3cf   :  { %2609 = vmatmul.mubr.bf16.gmra.mxu1 %v4395_v12 }
 0x3d0   :  { %4133 = vmatprep.mubr.bf16.mxu1 %v4496_v14 }
 0x3d7   :  { %4134 = vmatmul.mubr.bf16.vlgmr.msra.gmra.mxu1 %v4497_v41 }
 0x3d8   :  { %4137 = vmatprep.mubr.bf16.mxu1 %v4498_v3 }
 0x3df   :  { %4138 = vmatmul.mubr.bf16.gmra.mxu1 %v4499_v62 }
 0x457   :  { %v3965_v2 = vpop.f32.mrf.mxu1 }
 0x459   :  { %v4095_v16 = vpop.f32.mrf.mxu0  ;;  %v3966_v18 = vpop.f32.mrf.mxu1 }
 0x45a   :  { %v3967_v21 = vadd.f32 %v3966_v18, %v3965_v2 }
 0x45b   :  { %v2651_v43 = vpop.f32.mrf.mxu0  ;;  %v3968_v22 = vpop.f32.mrf.mxu1 }
 0x45c   :  { %v2652_v60 = vadd.f32 %v3967_v21, %v2651_v43 }
 0x45d   :  { %v4096_v25 = vpop.f32.mrf.mxu0  ;;  %v3969_v26 = vpop.f32.mrf.mxu1 }
 0x45e   :  { %v2714_v29 = vadd.f32 %v2652_v60, %v4876_v32  ;;  %v3970_v47 = vadd.f32 %v3969_v26, %v3968_v22 }
 0x45f   :  { %v2654_v31 = vpop.f32.mrf.mxu0  ;;  %v3971_v39 = vpop.f32.mrf.mxu1 }
 0x460   :  { %v4915_v9 = vadd.f32 %v4911_v23, %v2714_v29  ;;  %v2655_v50 = vadd.f32 %v3970_v47, %v2654_v31 }
 0x461   :  { %v4099_v0 = vpop.f32.mrf.mxu0  ;;  %v3972_v34 = vpop.f32.mrf.mxu1 }
 0x462   :  { %v2769_v17 = vmin.f32 %v4915_v9, 0.0  ;;  %v2715_v37 = vadd.f32 %v2655_v50, %v4878_v20  ;;  %v3973_v48 = vadd.f32 %v3972_v34, %v3971_v39  ;;  %vm2753_vm1 = vcmp.gt.f32.partialorder %v4915_v9, 0.0 }
 0x463   :  { %v2667_v40 = vpop.f32.mrf.mxu0  ;;  %v3974_v42 = vpop.f32.mrf.mxu1 }
 0x464   :  { %v4920_v44 = vadd.f32 %v4911_v23, %v2715_v37  ;;  %v2660_v32 = vadd.f32 %v4095_v16, %v3973_v48  ;;  %v2785_v58 = vmul.f32 1.442695, %v2769_v17 }
 0x465   :  { %v4100_v24 = vpop.f32.mrf.mxu0  ;;  %v3975_v49 = vpop.f32.mrf.mxu1 }
 0x466   :  { %v2770_v51 = vmin.f32 %v4920_v44, 0.0  ;;  %v2716_v57 = vadd.f32 %v2660_v32, %v4880_v38  ;;  %v3976_v59 = vadd.f32 %v3975_v49, %v3974_v42  ;;  %4428 = vpow2.f32 %v2785_v58 }
 0x467   :  { %v2670_v63 = vpop.f32.mrf.mxu0  ;;  %v3977_v4 = vpop.f32.mrf.mxu1  ;;  %vm2754_vm2 = vcmp.gt.f32.partialorder %v4920_v44, 0.0 }
 0x468   :  { %v4925_v19 = vadd.f32 %v4911_v23, %v2716_v57  ;;  %v2663_v20 = vadd.f32 %v4096_v25, %v3976_v59  ;;  %v2787_v33 = vmul.f32 1.442695, %v2770_v51 }
 0x469   :  { %v4927_v53 = vpop.f32.mrf.mxu0  ;;  %v3978_v28 = vpop.f32.mrf.mxu1 }
 0x46a   :  { %v2771_v5 = vmin.f32 %v4925_v19, 0.0  ;;  %v2717_v7 = vadd.f32 %v2663_v20, %v4882_v45  ;;  %v3979_v8 = vadd.f32 %v3978_v28, %v3977_v4  ;;  %4430 = vpow2.f32 %v2787_v33 }
 0x46b   :  { %v2683_v30 = vpop.f32.mrf.mxu0  ;;  %v3980_v54 = vpop.f32.mrf.mxu1  ;;  %vm2755_vm0 = vcmp.gt.f32.partialorder %v4925_v19, 0.0 }
 0x46c   :  { %v2789_v38 = vmul.f32 1.442695, %v2771_v5  ;;  %v4932_v11 = vadd.f32 %v4911_v23, %v2717_v7  ;;  %v2668_v6 = vadd.f32 %v3979_v8, %v2667_v40 }
 0x46d   :  { %v4934_v12 = vpop.f32.mrf.mxu0  ;;  %v3981_v14 = vpop.f32.mrf.mxu1 }
 0x46e   :  { %v2772_v41 = vmin.f32 %v4932_v11, 0.0  ;;  %v2718_v3 = vadd.f32 %v2668_v6, %v4884_v56  ;;  %v3982_v62 = vadd.f32 %v3981_v14, %v3980_v54  ;;  %4432 = vpow2.f32 %v2789_v38 }
 0x46f   :  { %v4938_v2 = vpop.f32.mrf.mxu0  ;;  %v3983_v45 = vpop.f32.mrf.mxu1  ;;  %vm2756_vm3 = vcmp.gt.f32.partialorder %v4932_v11, 0.0 }
 0x470   :  { %v2791_v16 = vmul.f32 1.442695, %v2772_v41  ;;  %v4941_v18 = vadd.f32 %v4911_v23, %v2718_v3  ;;  %v2671_v21 = vadd.f32 %v3982_v62, %v2670_v63 }
 0x471   :  { %v4943_v43 = vpop.f32.mrf.mxu0  ;;  %v3984_v22 = vpop.f32.mrf.mxu1 }
 0x472   :  { %v2773_v60 = vmin.f32 %v4941_v18, 0.0  ;;  %v2719_v25 = vadd.f32 %v2671_v21, %v4886_v52  ;;  %v3985_v26 = vadd.f32 %v3984_v22, %v3983_v45  ;;  %4434 = vpow2.f32 %v2791_v16 }
 0x473   :  { %v4947_v56 = vpop.f32.mrf.mxu0  ;;  %v3986_v29 = vpop.f32.mrf.mxu1  ;;  %vm2757_vm4 = vcmp.gt.f32.partialorder %v4941_v18, 0.0 }
 0x474   :  { %v2793_v47 = vmul.f32 1.442695, %v2773_v60  ;;  %v4950_v31 = vadd.f32 %v4911_v23, %v2719_v25  ;;  %v2676_v39 = vadd.f32 %v4099_v0, %v3985_v26  ;;  %v4429_v40 = vpop.eup %4428 }
 0x475   :  { %v4952_v50 = vpop.f32.mrf.mxu0  ;;  %v3987_v34 = vpop.f32.mrf.mxu1  ;;  %v3446_v20 = vadd.f32 -1.0, %v4429_v40 }
 0x476   :  { %v2774_v17 = vmin.f32 %v4950_v31, 0.0  ;;  %v2720_v37 = vadd.f32 %v2676_v39, %v4888_v61  ;;  %v3988_v48 = vadd.f32 %v3987_v34, %v3986_v29  ;;  %4436 = vpow2.f32 %v2793_v47  ;;  %v4966_v61 = vld [vmem:[%s5161_s7] ss:$0 sm:$0xff]  ;;  %s4640_s7 = smov [#allocation12]  }
 0x477   :  { %v4956_v52 = vpop.f32.mrf.mxu0  ;;  %v3989_v42 = vpop.f32.mrf.mxu1  ;;  %v2833_v45 = vsel %vm2753_vm1, %v4915_v9, %v3446_v20  ;;  %vm2758_vm5 = vcmp.gt.f32.partialorder %v4950_v31, 0.0  ;;  %s3150_s13 = sshll.u32 %s4640_s7, 4  ;;  %s3151_s13 = int_to_ptr.vmem [resolvable:$true] %s3150_s13 }
 0x478   :  { %v2795_v32 = vmul.f32 1.442695, %v2774_v17  ;;  %v4959_v49 = vadd.f32 %v4911_v23, %v2720_v37  ;;  %v2679_v58 = vadd.f32 %v4100_v24, %v3988_v48  ;;  %v4431_v57 = vpop.eup %4430  ;;  %s4600_s14 = scalar_lea.vmem %s3151_s13, 2048  ;;  %p4605_p12 = scmp.lt.s32.totalorder %s3151_s13, %s3151_s13 }
 0x479   :  { %v4127_v51 = vpop.f32.mrf.mxu0  ;;  %v3990_v0 = vpop.f32.mrf.mxu1  ;;  %v3447_v14 = vadd.f32 -1.0, %v4431_v57  ;;  %p4601_p11 = scmp.ne.s32.totalorder %s3151_s13, %s4600_s14  ;;  %p4606_p13 = scmp.lt.s32.totalorder %s4600_s14, %s4600_s14 }
 0x47a   :  { %v2775_v59 = vmin.f32 %v4959_v49, 0.0  ;;  %v2721_v63 = vadd.f32 %v2679_v58, %v4890_v10  ;;  %v3991_v4 = vadd.f32 %v3990_v0, %v3989_v42  ;;  %v2963_v28 = vadd.f32 %v4127_v51, %v4966_v61 }
 0x47b   :  { %v4433_v33 = vpop.eup %4432  ;;  %v2954_v5 = vpop.f32.mrf.mxu0  ;;  %4438 = vpow2.f32 %v2795_v32  ;;  %v2834_v47 = vsel %vm2754_vm2, %v4920_v44, %v3447_v14  ;;  %vm2759_vm6 = vcmp.gt.f32.partialorder %v4959_v49, 0.0  ;;  %p4607_p0 = por %p4606_p13, %p4605_p12 }
 0x47c   :  { %v3992_v7 = vpop.f32.mrf.mxu1  ;;  %v2797_v24 = vmul.f32 1.442695, %v2775_v59  ;;  %v3448_v8 = vadd.f32 -1.0, %v4433_v33  ;;  %v2684_v54 = vadd.f32 %v3991_v4, %v2683_v30  ;;  %v2955_v10 = vadd.f32 %v4966_v61, %v2954_v5 }
 0x47d   :  { %v4128_v38 = vpop.f32.mrf.mxu0  ;;  %v4973_v41 = vadd.f32 %v4911_v23, %v2721_v63  ;;  %p4608_p1 = pnand %p4607_p0, %p4601_p11 }
 0x47e   :  { %v3993_v6 = vpop.f32.mrf.mxu1  ;;  %v2835_v3 = vsel %vm2755_vm0, %v4925_v19, %v3448_v8  ;;  %v2722_v62 = vadd.f32 %v2684_v54, %v4892_v15  ;;  %v4980_v21 = vadd.f32 %v2955_v10, %v2833_v45  ;;  %v2966_v22 = vadd.f32 %v4128_v38, %v4966_v61 }
 0x47f   :  { %v4435_v16 = vpop.eup %4434  ;;  %v4978_v30 = vadd.f32 %v2963_v28, %v2835_v3  ;;  %v2957_v60 = vpop.f32.mrf.mxu0  ;;  %4440 = vpow2.f32 %v2797_v24  ;;  %v3994_v29 = vadd.f32 %v3993_v6, %v3992_v7  ;;  %v2776_v17 = vmin.f32 %v4973_v41, 0.0 }
 0x480   :  { %v3995_v25 = vpop.f32.mrf.mxu1  ;;  %v3449_v26 = vadd.f32 -1.0, %v4435_v16  ;;  %v2958_v19 = vadd.f32 %v4966_v61, %v2957_v60  ;;  %v3049_v9 = vmin.f32 %v4980_v21, 0.0  ;;  %v4991_v37 = vadd.f32 %v4911_v23, %v2722_v62 }
 0x481   :  { %v3051_v15 = vmin.f32 %v4978_v30, 0.0  ;;  %v4131_v34 = vpop.f32.mrf.mxu0  ;;  %v2687_v44 = vadd.f32 %v3994_v29, %v4938_v2  ;;  %v2799_v28 = vmul.f32 1.442695, %v2776_v17  ;;  %vm3035_vm7 = vcmp.gt.f32.partialorder %v4978_v30, 0.0 }
 0x482   :  { %v3996_v39 = vpop.f32.mrf.mxu1  ;;  %v2836_v48 = vsel %vm2756_vm3, %v4932_v11, %v3449_v26  ;;  %v4994_v40 = vadd.f32 %v2958_v19, %v2834_v47  ;;  %v3065_v32 = vmul.f32 1.442695, %v3049_v9  ;;  %v2777_v5 = vmin.f32 %v4991_v37, 0.0 }
 0x483   :  { %v3069_v42 = vmul.f32 1.442695, %v3051_v15  ;;  %v4996_v58 = vadd.f32 %v2966_v22, %v2836_v48  ;;  %v3997_v51 = vadd.f32 %v3996_v39, %v3995_v25  ;;  %v2970_v57 = vpop.f32.mrf.mxu0  ;;  %v4437_v59 = vpop.eup %4436  ;;  %vm3033_vm8 = vcmp.gt.f32.partialorder %v4980_v21, 0.0 }
 0x484   :  { %v3998_v0 = vpop.f32.mrf.mxu1  ;;  %v3050_v63 = vmin.f32 %v4994_v40, 0.0  ;;  %v3450_v8 = vadd.f32 -1.0, %v4437_v59  ;;  %v2971_v54 = vadd.f32 %v4966_v61, %v2970_v57  ;;  %v2801_v45 = vmul.f32 1.442695, %v2777_v5 }
 0x485   :  { %4442 = vpow2.f32 %v3069_v42  ;;  %v3052_v4 = vmin.f32 %v4996_v58, 0.0  ;;  %v2692_v20 = vadd.f32 %v4927_v53, %v3997_v51  ;;  %v5003_v33 = vpop.f32.mrf.mxu0  ;;  %v2723_v53 = vadd.f32 %v2687_v44, %v4894_v35 }
 0x486   :  { %v3999_v11 = vpop.f32.mrf.mxu1  ;;  %4444 = vpow2.f32 %v3065_v32  ;;  %v3067_v7 = vmul.f32 1.442695, %v3050_v63  ;;  %vm3034_vm9 = vcmp.gt.f32.partialorder %v4994_v40, 0.0  ;;  %vm3036_vm10 = vcmp.gt.f32.partialorder %v4996_v58, 0.0 }
 0x487   :  { %v3071_v24 = vmul.f32 1.442695, %v3052_v4  ;;  %v2724_v2 = vadd.f32 %v2692_v20, %v4896_v13  ;;  %v4000_v6 = vadd.f32 %v3999_v11, %v3998_v0  ;;  %v2973_v14 = vpop.f32.mrf.mxu0  ;;  %v2837_v13 = vsel %vm2757_vm4, %v4941_v18, %v3450_v8 }
 0x488   :  { %v4001_v10 = vpop.f32.mrf.mxu1  ;;  %v4439_v38 = vpop.eup %4438  ;;  %4446 = vpow2.f32 %v3067_v7  ;;  %v5017_v16 = vadd.f32 %v2971_v54, %v2837_v13  ;;  %v2974_v25 = vadd.f32 %v4966_v61, %v2973_v14  ;;  %v5023_v15 = vadd.f32 %v4911_v23, %v2723_v53 }
 0x489   :  { %4448 = vpow2.f32 %v3071_v24  ;;  %v5011_v3 = vadd.f32 %v4911_v23, %v2724_v2  ;;  %v2695_v35 = vadd.f32 %v4934_v12, %v4000_v6  ;;  %v3451_v60 = vadd.f32 -1.0, %v4439_v38 }
 0x48a   :  { %v4002_v62 = vpop.f32.mrf.mxu1  ;;  %4450 = vpow2.f32 %v2799_v28  ;;  %v2979_v18 = vadd.f32 %v4131_v34, %v4966_v61  ;;  %v3053_v9 = vmin.f32 %v5017_v16, 0.0  ;;  %vm2760_vm11 = vcmp.gt.f32.partialorder %v4973_v41, 0.0 }
 0x48b   :  { %v2779_v22 = vmin.f32 %v5011_v3, 0.0  ;;  %v4003_v26 = vadd.f32 %v4002_v62, %v4001_v10  ;;  %v2725_v47 = vadd.f32 %v2695_v35, %v4898_v27  ;;  %v2838_v17 = vsel %vm2758_vm5, %v4950_v31, %v3451_v60 }
 0x48c   :  { %v4004_v29 = vpop.f32.mrf.mxu1  ;;  %v4441_v19 = vpop.eup %4440  ;;  %v3073_v32 = vmul.f32 1.442695, %v3053_v9  ;;  %v5035_v0 = vadd.f32 %v2974_v25, %v2838_v17  ;;  %vm3037_vm12 = vcmp.gt.f32.partialorder %v5017_v16, 0.0  ;;  %vm2763_vm13 = vcmp.gt.f32.partialorder %v5011_v3, 0.0 }
 0x48d   :  { %v2805_v39 = vmul.f32 1.442695, %v2779_v22  ;;  %v3452_v12 = vadd.f32 -1.0, %v4441_v19  ;;  %v2700_v48 = vadd.f32 %v4003_v26, %v4947_v56  ;;  %v5033_v51 = vadd.f32 %v4911_v23, %v2725_v47 }
 0x48e   :  { %v4005_v42 = vpop.f32.mrf.mxu1  ;;  %v2778_v56 = vmin.f32 %v5023_v15, 0.0  ;;  %v3054_v63 = vmin.f32 %v5035_v0, 0.0  ;;  %vm2761_vm14 = vcmp.gt.f32.partialorder %v4991_v37, 0.0  ;;  %vm3038_vm15 = vcmp.gt.f32.partialorder %v5035_v0, 0.0 }
 0x48f   :  { %v4006_v34 = vadd.f32 %v4005_v42, %v4004_v29  ;;  %v2839_v27 = vsel %vm2759_vm6, %v4959_v49, %v3452_v12  ;;  %v2726_v57 = vadd.f32 %v2700_v48, %v4900_v1  ;;  %4452 = vpow2.f32 %v2805_v39 }
 0x490   :  { %v4007_v59 = vpop.f32.mrf.mxu1  ;;  %v5043_v31 = vadd.f32 %v2979_v18, %v2839_v27  ;;  %4454 = vpow2.f32 %v3073_v32  ;;  %v2780_v44 = vmin.f32 %v5033_v51, 0.0  ;;  %v3075_v2 = vmul.f32 1.442695, %v3054_v63 }
 0x491   :  { %v5048_v4 = vadd.f32 %v4911_v23, %v2726_v57  ;;  %v2703_v20 = vadd.f32 %v4006_v34, %v4956_v52  ;;  %4456 = vpow2.f32 %v2801_v45  ;;  %v2803_v14 = vmul.f32 1.442695, %v2778_v56 }
 0x492   :  { %v4008_v11 = vpop.f32.mrf.mxu1  ;;  %v4443_v49 = vpop.eup %4442  ;;  %v3055_v1 = vmin.f32 %v5043_v31, 0.0  ;;  %v2807_v24 = vmul.f32 1.442695, %v2780_v44  ;;  %4458 = vpow2.f32 %v3075_v2  ;;  %vm3039_vm0 = vcmp.gt.f32.partialorder %v5043_v31, 0.0 }
 0x493   :  { %v4009_v28 = vadd.f32 %v4008_v11, %v4007_v59  ;;  %v4445_v5 = vpop.eup %4444  ;;  %v3473_v7 = vadd.f32 -1.0, %v4443_v49  ;;  %v2781_v52 = vmin.f32 %v5048_v4, 0.0  ;;  %v2727_v13 = vadd.f32 %v2703_v20, %v4902_v36 }
 0x494   :  { %v4010_v8 = vpop.f32.mrf.mxu1  ;;  %v3471_v54 = vadd.f32 -1.0, %v4445_v5  ;;  %v3077_v10 = vmul.f32 1.442695, %v3055_v1  ;;  %vm2764_vm1 = vcmp.gt.f32.partialorder %v5033_v51, 0.0  ;;  %vm2762_vm2 = vcmp.gt.f32.partialorder %v5023_v15, 0.0 }
 0x495   :  { %v2708_v38 = vadd.f32 %v4943_v43, %v4009_v28  ;;  %v4447_v53 = vpop.eup %4446  ;;  %v3115_v6 = vsel %vm3035_vm7, %v4978_v30, %v3473_v7  ;;  %v2982_v30 = vadd.f32 %v5003_v33, %v4966_v61  ;;  %v2809_v18 = vmul.f32 1.442695, %v2781_v52 }
 0x496   :  { %v4011_v62 = vpop.f32.mrf.mxu1  ;;  %v4449_v45 = vpop.eup %4448  ;;  %3131 = vst [vmem:[#allocation12 + $0x10] sm:$0xff] %v3115_v6  ;;  %v3113_v35 = vsel %vm3033_vm8, %v4980_v21, %v3471_v54  ;;  %v3472_v22 = vadd.f32 -1.0, %v4447_v53  ;;  %4460 = vpow2.f32 %v3077_v10  ;;  %v5078_v33 = vadd.f32 %v4911_v23, %v2727_v13 }
 0x497   :  { %v2728_v43 = vadd.f32 %v2708_v38, %v4904_v46  ;;  %v4451_v60 = vpop.eup %4450  ;;  %3129 = vst [vmem:[#allocation12] sm:$0xff] %v3113_v35  ;;  %v3474_v25 = vadd.f32 -1.0, %v4449_v45  ;;  %v4012_v26 = vadd.f32 %v4011_v62, %v4010_v8  ;;  %4462 = vpow2.f32 %v2807_v24 }
 0x498   :  { %v4135_v29 = vpop.f32.mrf.mxu1  ;;  %v3114_v36 = vsel %vm3034_vm9, %v4994_v40, %v3472_v22  ;;  %v3453_v19 = vadd.f32 -1.0, %v4451_v60  ;;  %4464 = vpow2.f32 %v2803_v14  ;;  %vm2765_vm3 = vcmp.gt.f32.partialorder %v5048_v4, 0.0 }
 0x499   :  { %v5071_v21 = vadd.f32 %v4911_v23, %v2728_v43  ;;  %v3116_v46 = vsel %vm3036_vm10, %v4996_v58, %v3474_v25  ;;  %3130 = vst [vmem:[#allocation12 + $0x8] sm:$0xff] %v3114_v36  ;;  %v2711_v9 = vadd.f32 %v4952_v50, %v4012_v26  ;;  %v2995_v42 = vadd.f32 %v4135_v29, %v4966_v61 }
 0x49a   :  { %v2986_v47 = vpop.f32.mrf.mxu1  ;;  %3132 = vst [vmem:[#allocation12 + $0x18] sm:$0xff] %v3116_v46  ;;  %v2840_v40 = vsel %vm2760_vm11, %v4973_v41, %v3453_v19  ;;  %4466 = vpow2.f32 %v2809_v18  ;;  %v2782_v41 = vmin.f32 %v5078_v33, 0.0  ;;  %vm2766_vm7 = vcmp.gt.f32.partialorder %v5078_v33, 0.0 }
 0x49b   :  { %v2783_v39 = vmin.f32 %v5071_v21, 0.0  ;;  %v5083_v12 = vadd.f32 %v2982_v30, %v2840_v40  ;;  %v2729_v17 = vadd.f32 %v2711_v9, %v4906_v55  ;;  %v2987_v55 = vadd.f32 %v4966_v61, %v2986_v47 }
 0x49c   :  { %v4453_v58 = vpop.eup %4452  ;;  %v4136_v32 = vpop.f32.mrf.mxu1  ;;  %v2811_v28 = vmul.f32 1.442695, %v2782_v41  ;;  %vm2767_vm4 = vcmp.gt.f32.partialorder %v5071_v21, 0.0 }
 0x49d   :  { %v2813_v48 = vmul.f32 1.442695, %v2783_v39  ;;  %v4455_v50 = vpop.eup %4454  ;;  %v3056_v34 = vmin.f32 %v5083_v12, 0.0  ;;  %v5091_v27 = vadd.f32 %v4911_v23, %v2729_v17  ;;  %v3456_v57 = vadd.f32 -1.0, %v4453_v58 }
 0x49e   :  { %v4457_v59 = vpop.eup %4456  ;;  %v3475_v56 = vadd.f32 -1.0, %v4455_v50  ;;  %v2989_v1 = vpop.f32.mrf.mxu1  ;;  %v2998_v6 = vadd.f32 %v4136_v32, %v4966_v61  ;;  %vm3040_vm5 = vcmp.gt.f32.partialorder %v5083_v12, 0.0 }
 0x49f   :  { %4468 = vpow2.f32 %v2813_v48  ;;  %v3079_v44 = vmul.f32 1.442695, %v3056_v34  ;;  %v2784_v63 = vmin.f32 %v5091_v27, 0.0  ;;  %v2843_v20 = vsel %vm2763_vm13, %v5011_v3, %v3456_v57  ;;  %v4459_v24 = vpop.eup %4458 }
 0x4a0   :  { %v3454_v11 = vadd.f32 -1.0, %v4457_v59  ;;  %v3117_v49 = vsel %vm3037_vm12, %v5017_v16, %v3475_v56  ;;  %v5100_v23 = vadd.f32 %v2995_v42, %v2843_v20  ;;  %v4139_v8 = vpop.f32.mrf.mxu1  ;;  %v3476_v16 = vadd.f32 -1.0, %v4459_v24 }
 0x4a1   :  { %3133 = vst [vmem:[#allocation12 + $0x20] sm:$0xff] %v3117_v49  ;;  %4470 = vpow2.f32 %v3079_v44  ;;  %v2815_v5 = vmul.f32 1.442695, %v2784_v63  ;;  %v2990_v43 = vadd.f32 %v4966_v61, %v2989_v1  ;;  %v3011_v40 = vadd.f32 %v4139_v8, %v4966_v61 }
 0x4a2   :  { %v2841_v7 = vsel %vm2761_vm14, %v4991_v37, %v3454_v11  ;;  %v3059_v2 = vmin.f32 %v5100_v23, 0.0  ;;  %v3118_v37 = vsel %vm3038_vm15, %v5035_v0, %v3476_v16  ;;  %v3002_v45 = vpop.f32.mrf.mxu1  ;;  %vm2768_vm6 = vcmp.gt.f32.partialorder %v5091_v27, 0.0 }
 0x4a3   :  { %v5105_v3 = vadd.f32 %v2987_v55, %v2841_v7  ;;  %v4461_v54 = vpop.eup %4460  ;;  %4472 = vpow2.f32 %v2815_v5  ;;  %3134 = vst [vmem:[#allocation12 + $0x28] sm:$0xff] %v3118_v37  ;;  %vm3043_vm8 = vcmp.gt.f32.partialorder %v5100_v23, 0.0 }
 0x4a4   :  { %v4463_v10 = vpop.eup %4462  ;;  %v3477_v52 = vadd.f32 -1.0, %v4461_v54  ;;  %v3085_v38 = vmul.f32 1.442695, %v3059_v2  ;;  %4474 = vpow2.f32 %v2811_v28 }
 0x4a5   :  { %v3057_v53 = vmin.f32 %v5105_v3, 0.0  ;;  %v3457_v14 = vadd.f32 -1.0, %v4463_v10  ;;  %v4465_v35 = vpop.eup %4464  ;;  %vm3041_vm9 = vcmp.gt.f32.partialorder %v5105_v3, 0.0 }
 0x4a6   :  { %v3119_v13 = vsel %vm3039_vm0, %v5043_v31, %v3477_v52  ;;  %4476 = vpow2.f32 %v3085_v38  ;;  %v3455_v0 = vadd.f32 -1.0, %v4465_v35  ;;  %v3003_v31 = vadd.f32 %v4966_v61, %v3002_v45 }
 0x4a7   :  { %v3081_v62 = vmul.f32 1.442695, %v3057_v53  ;;  %3135 = vst [vmem:[#allocation12 + $0x30] sm:$0xff] %v3119_v13  ;;  %v2844_v22 = vsel %vm2764_vm1, %v5033_v51, %v3457_v14  ;;  %v4467_v25 = vpop.eup %4466  ;;  %v4140_v51 = vpop.f32.mrf.mxu1 }
 0x4a8   :  { %v5116_v60 = vadd.f32 %v2998_v6, %v2844_v22  ;;  %v2842_v26 = vsel %vm2762_vm2, %v5023_v15, %v3455_v0  ;;  %v3458_v29 = vadd.f32 -1.0, %v4467_v25  ;;  %v3014_v63 = vadd.f32 %v4140_v51, %v4966_v61 }
 0x4a9   :  { %4478 = vpow2.f32 %v3081_v62  ;;  %v5122_v19 = vadd.f32 %v2990_v43, %v2842_v26  ;;  %v3005_v32 = vpop.f32.mrf.mxu1 }
 0x4aa   :  { %v3060_v30 = vmin.f32 %v5116_v60, 0.0  ;;  %v2845_v9 = vsel %vm2765_vm3, %v5048_v4, %v3458_v29  ;;  %v3006_v55 = vadd.f32 %v4966_v61, %v3005_v32  ;;  %vm3044_vm10 = vcmp.gt.f32.partialorder %v5116_v60, 0.0 }
 0x4ab   :  { %v3058_v47 = vmin.f32 %v5122_v19, 0.0  ;;  %v5129_v39 = vadd.f32 %v3003_v31, %v2845_v9  ;;  %vm3042_vm11 = vcmp.gt.f32.partialorder %v5122_v19, 0.0 }
 0x4ac   :  { %v4469_v36 = vpop.eup %4468  ;;  %v3087_v18 = vmul.f32 1.442695, %v3060_v30 }
 0x4ad   :  { %v3460_v46 = vadd.f32 -1.0, %v4469_v36  ;;  %v3083_v48 = vmul.f32 1.442695, %v3058_v47  ;;  %v3061_v4 = vmin.f32 %v5129_v39, 0.0  ;;  %vm3045_vm12 = vcmp.gt.f32.partialorder %v5129_v39, 0.0 }
 0x4ae   :  { %v4471_v15 = vpop.eup %4470  ;;  %4480 = vpow2.f32 %v3087_v18 }
 0x4af   :  { %v2847_v17 = vsel %vm2767_vm4, %v5071_v21, %v3460_v46  ;;  %v3478_v58 = vadd.f32 -1.0, %v4471_v15  ;;  %4482 = vpow2.f32 %v3083_v48  ;;  %v3089_v59 = vmul.f32 1.442695, %v3061_v4 }
 0x4b0   :  { %v3031_v42 = vadd.f32 %v3011_v40, %v2847_v17  ;;  %v4473_v50 = vpop.eup %4472 }
 0x4b1   :  { %v3120_v34 = vsel %vm3040_vm5, %v5083_v12, %v3478_v58  ;;  %v4475_v57 = vpop.eup %4474  ;;  %v3461_v56 = vadd.f32 -1.0, %v4473_v50  ;;  %4484 = vpow2.f32 %v3089_v59 }
 0x4b2   :  { %v3063_v41 = vmin.f32 %v3031_v42, 0.0  ;;  %3136 = vst [vmem:[#allocation12 + $0x38] sm:$0xff] %v3120_v34  ;;  %v3459_v20 = vadd.f32 -1.0, %v4475_v57  ;;  %vm3047_vm13 = vcmp.gt.f32.partialorder %v3031_v42, 0.0 }
 0x4b3   :  { %v4477_v21 = vpop.eup %4476  ;;  %v2848_v49 = vsel %vm2768_vm6, %v5091_v27, %v3461_v56 }
 0x4b4   :  { %v3093_v44 = vmul.f32 1.442695, %v3063_v41  ;;  %v3481_v11 = vadd.f32 -1.0, %v4477_v21  ;;  %v3032_v1 = vadd.f32 %v3014_v63, %v2848_v49  ;;  %v2846_v28 = vsel %vm2766_vm7, %v5078_v33, %v3459_v20 }
 0x4b5   :  { %v3030_v24 = vadd.f32 %v3006_v55, %v2846_v28 }
 0x4b6   :  { %v4479_v12 = vpop.eup %4478  ;;  %4486 = vpow2.f32 %v3093_v44  ;;  %v3123_v5 = vsel %vm3043_vm8, %v5100_v23, %v3481_v11  ;;  %v3064_v61 = vmin.f32 %v3032_v1, 0.0  ;;  %vm3048_vm14 = vcmp.gt.f32.partialorder %v3032_v1, 0.0 }
 0x4b7   :  { %v3479_v7 = vadd.f32 -1.0, %v4479_v12  ;;  %3139 = vst [vmem:[#allocation12 + $0x50] sm:$0xff] %v3123_v5  ;;  %v3062_v27 = vmin.f32 %v3030_v24, 0.0  ;;  %vm3046_vm15 = vcmp.gt.f32.partialorder %v3030_v24, 0.0 }
 0x4b8   :  { %v3095_v8 = vmul.f32 1.442695, %v3064_v61 }
 0x4b9   :  { %v3121_v2 = vsel %vm3041_vm9, %v5105_v3, %v3479_v7  ;;  %v3091_v54 = vmul.f32 1.442695, %v3062_v27 }
 0x4ba   :  { %3137 = vst [vmem:[#allocation12 + $0x40] sm:$0xff] %v3121_v2  ;;  %4488 = vpow2.f32 %v3095_v8 }
 0x4bb   :  { %v4481_v16 = vpop.eup %4480  ;;  %4490 = vpow2.f32 %v3091_v54 }
 0x4bc   :  { %v3482_v10 = vadd.f32 -1.0, %v4481_v16  ;;  %v4483_v33 = vpop.eup %4482 }
 0x4bd   :  { %v3480_v52 = vadd.f32 -1.0, %v4483_v33 }
 0x4be   :  { %v3124_v23 = vsel %vm3044_vm10, %v5116_v60, %v3482_v10  ;;  %v4485_v38 = vpop.eup %4484 }
 0x4bf   :  { %3140 = vst [vmem:[#allocation12 + $0x58] sm:$0xff] %v3124_v23  ;;  %v3122_v3 = vsel %vm3042_vm11, %v5122_v19, %v3480_v52  ;;  %v3483_v6 = vadd.f32 -1.0, %v4485_v38 }
 0x4c0   :  { %3138 = vst [vmem:[#allocation12 + $0x48] sm:$0xff] %v3122_v3 }
 0x4c1   :  { %v3125_v14 = vsel %vm3045_vm12, %v5129_v39, %v3483_v6 }
 0x4c2   :  { %3141 = vst [vmem:[#allocation12 + $0x60] sm:$0xff] %v3125_v14 }
 0x4c3   :  { %v4487_v53 = vpop.eup %4486 }
 0x4c4   :  { %v3485_v37 = vadd.f32 -1.0, %v4487_v53 }
 0x4c6   :  { %v3127_v13 = vsel %vm3047_vm13, %v3031_v42, %v3485_v37 }
 0x4c7   :  { %3143 = vst [vmem:[#allocation12 + $0x70] sm:$0xff] %v3127_v13  ;;  %v4489_v62 = vpop.eup %4488 }
 0x4c8   :  { %v4491_v45 = vpop.eup %4490  ;;  %v3486_v35 = vadd.f32 -1.0, %v4489_v62 }
 0x4c9   :  { %v3484_v22 = vadd.f32 -1.0, %v4491_v45 }
 0x4ca   :  { %v3128_v43 = vsel %vm3048_vm14, %v3032_v1, %v3486_v35 }
 0x4cb   :  { %3144 = vst [vmem:[#allocation12 + $0x78] sm:$0xff] %v3128_v43  ;;  %v3126_v60 = vsel %vm3046_vm15, %v3030_v24, %v3484_v22 }
 0x4cc   :  { %3142 = vst [vmem:[#allocation12 + $0x68] sm:$0xff] %v3126_v60 }
 0x4cd   :  { %4611 = shalt.err (!%p4608_p1)
}
 0x4ce   :  { %s4641_s15 = smov 128   ;;  %s4642_s16 = smov 8  }
 0x4cf   :  { %3156 = dma.vmem_to_hbm [thread:$0]  %s3151_s13, 2048, %s5162_s8, [#allocation5], %s4641_s15, %s4641_s15, %s4642_s16  }
 0x4d0   :  { %4626 = dma.done.wait [#allocation5], 2048  }
 0x4d1   :  { %4627 = vsyncadd [#allocation5], 4294965248 }
 0x4d2   :  { %3160 = vsyncpa [#allocation4], 1 }
 0x4d3   :  { %3161 = vsyncpa [#allocation7], 1 }
 0x4d4   :  { %3162 = vsyncpa [#allocation10], 1 }
 0x4d5   :  { %3163 = vsyncpa [#allocation5], 1 }

</bundles_post_ra>
